<compile_context>
chip_gen: v7x
topology: tpu7x:2x2x1
jax: 0.10.0
libtpu: 0.0.40
codegen_flags: <defaults>
</compile_context>

<pallas_src>
import functools

import jax
import jax.numpy as jnp
from jax.experimental import pallas as pl
from jax.experimental.pallas import tpu as pltpu


# ---------------------------------------------------------------------------
# In-kernel helpers
# ---------------------------------------------------------------------------
def _erf_approx(x):
    # Abramowitz & Stegun 7.1.26 rational approximation of erf (max abs err ~1.5e-7).
    a1, a2, a3, a4, a5 = 0.254829592, -0.284496736, 1.421413741, -1.453152027, 1.061405429
    p = 0.3275911
    ax = jnp.abs(x)
    t = 1.0 / (1.0 + p * ax)
    poly = ((((a5 * t + a4) * t + a3) * t + a2) * t + a1) * t
    y = 1.0 - poly * jnp.exp(-ax * ax)
    return jnp.where(x >= 0.0, y, -y)


def _gelu_exact(x):
    return 0.5 * x * (1.0 + _erf_approx(x * 0.7071067811865475))


def _layer_norm(x, g, b, eps=1e-5):
    mu = jnp.mean(x, axis=-1, keepdims=True)
    var = jnp.mean(jnp.square(x - mu), axis=-1, keepdims=True)
    return (x - mu) * jax.lax.rsqrt(var + eps) * g + b


# ---------------------------------------------------------------------------
# Pallas kernels
# ---------------------------------------------------------------------------
def _embed_kernel(x_ref, w_ref, b_ref, o_ref):
    # Patch embedding: x @ W + b   (bf16 MXU inputs, f32 accumulate)
    o_ref[...] = (
        jnp.dot(x_ref[...].astype(jnp.bfloat16), w_ref[...],
                preferred_element_type=jnp.float32)
        + b_ref[...]
    )


def _block_kernel(x_ref, g1_ref, b1_ref, wqkv_ref, wo_ref, bo_ref,
                  g2_ref, b2_ref, w1_ref, bf1_ref, w2_ref, bf2_ref,
                  o_ref, *, heads, dim_head, seq_valid, scale):
    """One fused transformer block for a single batch element (whole seq in VMEM)."""
    f32, bf16 = jnp.float32, jnp.bfloat16
    x = x_ref[0]                                   # (S, dim) f32 residual stream
    S = x.shape[0]
    inner = heads * dim_head

    # ---- PreNorm + Attention ----
    xn = _layer_norm(x, g1_ref[...], b1_ref[...])
    qkv = jnp.dot(xn.astype(bf16), wqkv_ref[...],
                  preferred_element_type=f32)      # (S, 3*inner)
    q = qkv[:, 0 * inner:1 * inner]
    k = qkv[:, 1 * inner:2 * inner]
    v = qkv[:, 2 * inner:3 * inner]

    # mask padded key columns (sequence padded to a sublane multiple)
    key_mask = jax.lax.broadcasted_iota(jnp.int32, (S, S), 1) < seq_valid

    head_outs = []
    for h in range(heads):                         # heads is small & static
        sl = slice(h * dim_head, (h + 1) * dim_head)
        qh, kh, vh = q[:, sl], k[:, sl], v[:, sl]
        s = jax.lax.dot_general(qh.astype(bf16), kh.astype(bf16),
                                (((1,), (1,)), ((), ())),
                                preferred_element_type=f32) * scale
        s = jnp.where(key_mask, s, -1e30)
        m = jnp.max(s, axis=-1, keepdims=True)
        p = jnp.exp(s - m)
        l = jnp.sum(p, axis=-1, keepdims=True)
        attn = p * pl.reciprocal(l, approx=True)   # EUP reciprocal
        head_outs.append(
            jnp.dot(attn.astype(bf16), vh.astype(bf16), preferred_element_type=f32))
    o = jnp.concatenate(head_outs, axis=-1)        # (S, inner)

    o = jnp.dot(o.astype(bf16), wo_ref[...], preferred_element_type=f32) + bo_ref[...]
    x = x + o                                      # residual 1 (fused)

    # ---- PreNorm + FeedForward ----
    xn2 = _layer_norm(x, g2_ref[...], b2_ref[...])
    hdd = jnp.dot(xn2.astype(bf16), w1_ref[...], preferred_element_type=f32) + bf1_ref[...]
    hdd = _gelu_exact(hdd)
    ff = jnp.dot(hdd.astype(bf16), w2_ref[...], preferred_element_type=f32) + bf2_ref[...]

    o_ref[0] = x + ff                              # residual 2 (fused)


def _head_kernel(x_ref, g_ref, b_ref, w_ref, hb_ref, o_ref):
    # mlp_head: LayerNorm + Linear fused
    xn = _layer_norm(x_ref[...], g_ref[...], b_ref[...])
    o_ref[...] = (
        jnp.dot(xn.astype(jnp.bfloat16), w_ref[...], preferred_element_type=jnp.float32)
        + hb_ref[...]
    )


# ---------------------------------------------------------------------------
# Kernel wrappers
# ---------------------------------------------------------------------------
def _full_spec(shape):
    return pl.BlockSpec(shape, lambda *_: (0,) * len(shape))


def patch_embed(x2d, w, b):
    M, K = x2d.shape
    N = w.shape[1]
    return pl.pallas_call(
        _embed_kernel,
        out_shape=jax.ShapeDtypeStruct((M, N), jnp.float32),
        grid=(1,),
        in_specs=[_full_spec((M, K)), _full_spec((K, N)), _full_spec((1, N))],
        out_specs=_full_spec((M, N)),
        compiler_params=pltpu.CompilerParams(dimension_semantics=("arbitrary",)),
    )(x2d.astype(jnp.float32), w.astype(jnp.bfloat16),
      b.reshape(1, N).astype(jnp.float32))


def transformer_block(x, lw, *, heads, dim_head, seq_valid):
    B, S, dim = x.shape
    inner = heads * dim_head
    mlp_dim = lw["ff1_w"].shape[1]
    scale = float(dim_head) ** -0.5

    def row(v):
        return v.reshape(1, -1).astype(jnp.float32)

    kernel = functools.partial(_block_kernel, heads=heads, dim_head=dim_head,
                               seq_valid=seq_valid, scale=scale)
    xseq_spec = pl.BlockSpec((1, S, dim), lambda b: (b, 0, 0))
    return pl.pallas_call(
        kernel,
        out_shape=jax.ShapeDtypeStruct((B, S, dim), jnp.float32),
        grid=(B,),
        in_specs=[
            xseq_spec,
            _full_spec((1, dim)), _full_spec((1, dim)),       # ln1
            _full_spec((dim, 3 * inner)),                     # qkv (bf16)
            _full_spec((inner, dim)), _full_spec((1, dim)),   # out proj (bf16) + bias
            _full_spec((1, dim)), _full_spec((1, dim)),       # ln2
            _full_spec((dim, mlp_dim)), _full_spec((1, mlp_dim)),  # ff1 (bf16) + bias
            _full_spec((mlp_dim, dim)), _full_spec((1, dim)),      # ff2 (bf16) + bias
        ],
        out_specs=xseq_spec,
        compiler_params=pltpu.CompilerParams(dimension_semantics=("parallel",)),
    )(
        x,
        row(lw["ln1_g"]), row(lw["ln1_b"]),
        lw["qkv_w"].astype(jnp.bfloat16),
        lw["out_w"].astype(jnp.bfloat16), row(lw["out_b"]),
        row(lw["ln2_g"]), row(lw["ln2_b"]),
        lw["ff1_w"].astype(jnp.bfloat16), row(lw["ff1_b"]),
        lw["ff2_w"].astype(jnp.bfloat16), row(lw["ff2_b"]),
    )


def mlp_head(pooled, g, b, w, hb):
    B, D = pooled.shape
    N = w.shape[1]
    return pl.pallas_call(
        _head_kernel,
        out_shape=jax.ShapeDtypeStruct((B, N), jnp.float32),
        grid=(1,),
        in_specs=[_full_spec((B, D)), _full_spec((1, D)), _full_spec((1, D)),
                  _full_spec((D, N)), _full_spec((1, N))],
        out_specs=_full_spec((B, N)),
        compiler_params=pltpu.CompilerParams(dimension_semantics=("arbitrary",)),
    )(pooled, g.reshape(1, D).astype(jnp.float32), b.reshape(1, D).astype(jnp.float32),
      w.astype(jnp.bfloat16), hb.reshape(1, N).astype(jnp.float32))


# ---------------------------------------------------------------------------
# Parameter init (deterministic, synthetic)
# ---------------------------------------------------------------------------
def init_params(key, *, patch_dim, num_patches, dim, depth, heads, dim_head, mlp_dim,
                num_classes):
    inner = heads * dim_head
    keys = iter(jax.random.split(key, 8 + depth * 8))

    def nrm(k, shape, scale=0.02):
        return jax.random.normal(k, shape, dtype=jnp.float32) * scale

    params = {
        "patch_w": nrm(next(keys), (patch_dim, dim)),
        "patch_b": jnp.zeros((dim,), jnp.float32),
        "pos_emb": jax.random.normal(next(keys), (1, num_patches + 1, dim), dtype=jnp.float32),
        "cls_token": jax.random.normal(next(keys), (1, 1, dim), dtype=jnp.float32),
        "head_ln_g": jnp.ones((dim,), jnp.float32),
        "head_ln_b": jnp.zeros((dim,), jnp.float32),
        "head_w": nrm(next(keys), (dim, num_classes)),
        "head_b": jnp.zeros((num_classes,), jnp.float32),
        "layers": [],
    }
    for _ in range(depth):
        params["layers"].append({
            "ln1_g": jnp.ones((dim,), jnp.float32),
            "ln1_b": jnp.zeros((dim,), jnp.float32),
            "qkv_w": nrm(next(keys), (dim, 3 * inner)),      # to_qkv has no bias
            "out_w": nrm(next(keys), (inner, dim)),
            "out_b": jnp.zeros((dim,), jnp.float32),
            "ln2_g": jnp.ones((dim,), jnp.float32),
            "ln2_b": jnp.zeros((dim,), jnp.float32),
            "ff1_w": nrm(next(keys), (dim, mlp_dim)),
            "ff1_b": jnp.zeros((mlp_dim,), jnp.float32),
            "ff2_w": nrm(next(keys), (mlp_dim, dim)),
            "ff2_b": jnp.zeros((dim,), jnp.float32),
        })
    return params


# ---------------------------------------------------------------------------
# ViT forward (conv=False, pool='cls')
# ---------------------------------------------------------------------------
def vit_forward(img, params, *, patch, dim, heads, dim_head, pool="cls"):
    B, C, H, W, D = img.shape
    ph = pw = pd = patch
    h, w, d = H // ph, W // pw, D // pd

    # Rearrange 'b c (h p1) (w p2) (d p3) -> b (h w d) (p1 p2 p3 c)'
    x = img.reshape(B, C, h, ph, w, pw, d, pd)
    x = x.transpose(0, 2, 4, 6, 3, 5, 7, 1)
    x = x.reshape(B, h * w * d, ph * pw * pd * C)
    n = x.shape[1]

    # Patch embedding (Pallas) + cls token + positional embedding (one-time JAX glue)
    emb = patch_embed(x.reshape(B * n, -1), params["patch_w"], params["patch_b"])
    emb = emb.reshape(B, n, dim)
    cls = jnp.broadcast_to(params["cls_token"], (B, 1, dim))
    x = jnp.concatenate([cls, emb], axis=1) + params["pos_emb"][:, : n + 1]

    # Pad sequence to a sublane multiple; padded key columns are masked in-kernel.
    seq_valid = n + 1
    S = max(8, ((seq_valid + 7) // 8) * 8)
    x = jnp.pad(x, ((0, 0), (0, S - seq_valid), (0, 0)))

    # Fused transformer layers (one pallas_call per layer)
    for layer in params["layers"]:
        x = transformer_block(x, layer, heads=heads, dim_head=dim_head, seq_valid=seq_valid)

    # Pool
    if pool == "mean":
        pooled = jnp.mean(x[:, :seq_valid], axis=1)
    else:  # 'cls'
        pooled = x[:, 0]

    # mlp_head: LayerNorm + Linear (fused Pallas kernel)
    return mlp_head(pooled, params["head_ln_g"], params["head_ln_b"],
                    params["head_w"], params["head_b"])


# ---------------------------------------------------------------------------
if __name__ == "__main__":
    IMAGE_SIZE = 16       # cubic volume 16x16x16
    PATCH_SIZE = 8        # -> num_patches = 2*2*2 = 8, patch_dim = 1*8*8*8 = 512
    CHANNELS = 1
    DIM = 32
    DEPTH = 2
    HEADS = 2
    DIM_HEAD = 8
    MLP_DIM = 64
    NUM_CLASSES = 4
    B = 2

    num_patches = (IMAGE_SIZE // PATCH_SIZE) ** 3
    patch_dim = CHANNELS * PATCH_SIZE ** 3

    key = jax.random.PRNGKey(0)
    k_img, k_par = jax.random.split(key)

    img = jax.random.normal(
        k_img, (B, CHANNELS, IMAGE_SIZE, IMAGE_SIZE, IMAGE_SIZE), dtype=jnp.float32)

    params = init_params(
        k_par, patch_dim=patch_dim, num_patches=num_patches, dim=DIM, depth=DEPTH,
        heads=HEADS, dim_head=DIM_HEAD, mlp_dim=MLP_DIM, num_classes=NUM_CLASSES)

    fwd = jax.jit(functools.partial(
        vit_forward, patch=PATCH_SIZE, dim=DIM, heads=HEADS, dim_head=DIM_HEAD, pool="cls"))

    logits = jax.block_until_ready(fwd(img, params))

    assert logits.shape == (B, NUM_CLASSES), logits.shape
    assert bool(jnp.all(jnp.isfinite(logits)))
    print("KERNEL_OK")
</pallas_src>

<mosaic_0001>
module attributes {stable_mosaic.version = 11 : i64} {
  func.func @_embed_kernel(%arg0: i32, %arg1: memref<16x512xf32, #tpu.memory_space<vmem>>, %arg2: memref<512x32xbf16, #tpu.memory_space<vmem>>, %arg3: memref<1x32xf32, #tpu.memory_space<vmem>>, %arg4: memref<16x32xf32, #tpu.memory_space<vmem>>) attributes {dimension_semantics = [#tpu.dimension_semantics<arbitrary>], iteration_bounds = array<i64: 1>, scalar_prefetch = 0 : i64, scratch_operands = 0 : i64, tpu.core_type = #tpu.core_type<tc>, window_params = [{pipeline_mode = #tpu.pipeline_mode<synchronous>, transform_indices = @transform_0, window_bounds = array<i64: 16, 512>}, {pipeline_mode = #tpu.pipeline_mode<synchronous>, transform_indices = @transform_1, window_bounds = array<i64: 512, 32>}, {pipeline_mode = #tpu.pipeline_mode<synchronous>, transform_indices = @transform_2, window_bounds = array<i64: 1, 32>}, {pipeline_mode = #tpu.pipeline_mode<synchronous>, transform_indices = @transform_3, window_bounds = array<i64: 16, 32>}]} {
    %c0 = arith.constant 0 : index
    %c0_0 = arith.constant 0 : index
    %0 = vector.load %arg1[%c0, %c0_0] : memref<16x512xf32, #tpu.memory_space<vmem>>, vector<16x512xf32>
    %1 = arith.truncf %0 : vector<16x512xf32> to vector<16x512xbf16>
    %c0_1 = arith.constant 0 : index
    %c0_2 = arith.constant 0 : index
    %2 = vector.load %arg2[%c0_1, %c0_2] : memref<512x32xbf16, #tpu.memory_space<vmem>>, vector<512x32xbf16>
    %cst = arith.constant dense<0.000000e+00> : vector<16x32xf32>
    %3 = tpu.matmul %1, %2, %cst {dimension_numbers = #tpu.dot_dimension_numbers<[1], [0], [0], [1], [0, 0, 1, 1], [], []>} : vector<16x512xbf16>, vector<512x32xbf16>, vector<16x32xf32> -> vector<16x32xf32>
    %c0_3 = arith.constant 0 : index
    %c0_4 = arith.constant 0 : index
    %4 = vector.load %arg3[%c0_3, %c0_4] : memref<1x32xf32, #tpu.memory_space<vmem>>, vector<1x32xf32>
    %5 = vector.broadcast %4 : vector<1x32xf32> to vector<16x32xf32>
    %6 = arith.addf %3, %5 : vector<16x32xf32>
    %c0_5 = arith.constant 0 : index
    %c0_6 = arith.constant 0 : index
    %7 = vector.load %arg4[%c0_5, %c0_6] : memref<16x32xf32, #tpu.memory_space<vmem>>, vector<16x32xf32>
    tpu.vector_store %arg4[%c0_5, %c0_6], %6 {strides = array<i32>} : memref<16x32xf32, #tpu.memory_space<vmem>>, vector<16x32xf32>,
    return
  }
  func.func @transform_0(%arg0: i32) -> (i32, i32) {
    %c0_i32 = arith.constant 0 : i32
    %c0_i32_0 = arith.constant 0 : i32
    %c0_i32_1 = arith.constant 0 : i32
    return %c0_i32, %c0_i32_0 : i32, i32
  }
  func.func @transform_1(%arg0: i32) -> (i32, i32) {
    %c0_i32 = arith.constant 0 : i32
    %c0_i32_0 = arith.constant 0 : i32
    %c0_i32_1 = arith.constant 0 : i32
    return %c0_i32, %c0_i32_0 : i32, i32
  }
  func.func @transform_2(%arg0: i32) -> (i32, i32) {
    %c0_i32 = arith.constant 0 : i32
    %c0_i32_0 = arith.constant 0 : i32
    %c0_i32_1 = arith.constant 0 : i32
    return %c0_i32, %c0_i32_0 : i32, i32
  }
  func.func @transform_3(%arg0: i32) -> (i32, i32) {
    %c0_i32 = arith.constant 0 : i32
    %c0_i32_0 = arith.constant 0 : i32
    %c0_i32_1 = arith.constant 0 : i32
    return %c0_i32, %c0_i32_0 : i32, i32
  }
}

module attributes {stable_mosaic.version = 11 : i64} {
  func.func @_block_kernel(%arg0: i32, %arg1: memref<1x16x32xf32, #tpu.memory_space<vmem>>, %arg2: memref<1x32xf32, #tpu.memory_space<vmem>>, %arg3: memref<1x32xf32, #tpu.memory_space<vmem>>, %arg4: memref<32x48xbf16, #tpu.memory_space<vmem>>, %arg5: memref<16x32xbf16, #tpu.memory_space<vmem>>, %arg6: memref<1x32xf32, #tpu.memory_space<vmem>>, %arg7: memref<1x32xf32, #tpu.memory_space<vmem>>, %arg8: memref<1x32xf32, #tpu.memory_space<vmem>>, %arg9: memref<32x64xbf16, #tpu.memory_space<vmem>>, %arg10: memref<1x64xf32, #tpu.memory_space<vmem>>, %arg11: memref<64x32xbf16, #tpu.memory_space<vmem>>, %arg12: memref<1x32xf32, #tpu.memory_space<vmem>>, %arg13: memref<1x16x32xf32, #tpu.memory_space<vmem>>) attributes {dimension_semantics = [#tpu.dimension_semantics<parallel>], iteration_bounds = array<i64: 2>, scalar_prefetch = 0 : i64, scratch_operands = 0 : i64, tpu.core_type = #tpu.core_type<tc>, window_params = [{transform_indices = @transform_0, window_bounds = array<i64: 1, 16, 32>}, {pipeline_mode = #tpu.pipeline_mode<synchronous>, transform_indices = @transform_1, window_bounds = array<i64: 1, 32>}, {pipeline_mode = #tpu.pipeline_mode<synchronous>, transform_indices = @transform_2, window_bounds = array<i64: 1, 32>}, {pipeline_mode = #tpu.pipeline_mode<synchronous>, transform_indices = @transform_3, window_bounds = array<i64: 32, 48>}, {pipeline_mode = #tpu.pipeline_mode<synchronous>, transform_indices = @transform_4, window_bounds = array<i64: 16, 32>}, {pipeline_mode = #tpu.pipeline_mode<synchronous>, transform_indices = @transform_5, window_bounds = array<i64: 1, 32>}, {pipeline_mode = #tpu.pipeline_mode<synchronous>, transform_indices = @transform_6, window_bounds = array<i64: 1, 32>}, {pipeline_mode = #tpu.pipeline_mode<synchronous>, transform_indices = @transform_7, window_bounds = array<i64: 1, 32>}, {pipeline_mode = #tpu.pipeline_mode<synchronous>, transform_indices = @transform_8, window_bounds = array<i64: 32, 64>}, {pipeline_mode = #tpu.pipeline_mode<synchronous>, transform_indices = @transform_9, window_bounds = array<i64: 1, 64>}, {pipeline_mode = #tpu.pipeline_mode<synchronous>, transform_indices = @transform_10, window_bounds = array<i64: 64, 32>}, {pipeline_mode = #tpu.pipeline_mode<synchronous>, transform_indices = @transform_11, window_bounds = array<i64: 1, 32>}, {transform_indices = @transform_12, window_bounds = array<i64: 1, 16, 32>}]} {
    %c0 = arith.constant 0 : index
    %c0_0 = arith.constant 0 : index
    %c0_1 = arith.constant 0 : index
    %0 = vector.load %arg1[%c0, %c0_0, %c0_1] : memref<1x16x32xf32, #tpu.memory_space<vmem>>, vector<1x16x32xf32>
    %1 = vector.shape_cast %0 : vector<1x16x32xf32> to vector<16x32xf32>
    %c0_2 = arith.constant 0 : index
    %c0_3 = arith.constant 0 : index
    %2 = vector.load %arg2[%c0_2, %c0_3] : memref<1x32xf32, #tpu.memory_space<vmem>>, vector<1x32xf32>
    %c0_4 = arith.constant 0 : index
    %c0_5 = arith.constant 0 : index
    %3 = vector.load %arg3[%c0_4, %c0_5] : memref<1x32xf32, #tpu.memory_space<vmem>>, vector<1x32xf32>
    %cst = arith.constant dense<0.000000e+00> : vector<16xf32>
    %4 = vector.multi_reduction <add>, %1, %cst [1] : vector<16x32xf32> to vector<16xf32>
    %5 = vector.shape_cast %4 : vector<16xf32> to vector<16x1xf32>
    %cst_6 = arith.constant 3.200000e+01 : f32
    %6 = vector.broadcast %cst_6 : f32 to vector<16x1xf32>
    %7 = arith.divf %5, %6 : vector<16x1xf32>
    %8 = vector.broadcast %7 : vector<16x1xf32> to vector<16x32xf32>
    %9 = arith.subf %1, %8 : vector<16x32xf32>
    %10 = arith.mulf %9, %9 : vector<16x32xf32>
    %cst_7 = arith.constant dense<0.000000e+00> : vector<16xf32>
    %11 = vector.multi_reduction <add>, %10, %cst_7 [1] : vector<16x32xf32> to vector<16xf32>
    %12 = vector.shape_cast %11 : vector<16xf32> to vector<16x1xf32>
    %cst_8 = arith.constant 3.200000e+01 : f32
    %13 = vector.broadcast %cst_8 : f32 to vector<16x1xf32>
    %14 = arith.divf %12, %13 : vector<16x1xf32>
    %15 = vector.broadcast %7 : vector<16x1xf32> to vector<16x32xf32>
    %16 = arith.subf %1, %15 : vector<16x32xf32>
    %cst_9 = arith.constant 9.99999974E-6 : f32
    %17 = vector.broadcast %cst_9 : f32 to vector<16x1xf32>
    %18 = arith.addf %14, %17 : vector<16x1xf32>
    %19 = math.rsqrt %18 : vector<16x1xf32>
    %20 = vector.broadcast %19 : vector<16x1xf32> to vector<16x32xf32>
    %21 = arith.mulf %16, %20 : vector<16x32xf32>
    %22 = vector.broadcast %2 : vector<1x32xf32> to vector<16x32xf32>
    %23 = arith.mulf %21, %22 : vector<16x32xf32>
    %24 = vector.broadcast %3 : vector<1x32xf32> to vector<16x32xf32>
    %25 = arith.addf %23, %24 : vector<16x32xf32>
    %26 = arith.truncf %25 : vector<16x32xf32> to vector<16x32xbf16>
    %c0_10 = arith.constant 0 : index
    %c0_11 = arith.constant 0 : index
    %27 = vector.load %arg4[%c0_10, %c0_11] : memref<32x48xbf16, #tpu.memory_space<vmem>>, vector<32x48xbf16>
    %cst_12 = arith.constant dense<0.000000e+00> : vector<16x48xf32>
    %28 = tpu.matmul %26, %27, %cst_12 {dimension_numbers = #tpu.dot_dimension_numbers<[1], [0], [0], [1], [0, 0, 1, 1], [], []>} : vector<16x32xbf16>, vector<32x48xbf16>, vector<16x48xf32> -> vector<16x48xf32>
    %29 = vector.extract_strided_slice %28 {offsets = [0, 0], sizes = [16, 16], strides = [1, 1]} : vector<16x48xf32> to vector<16x16xf32>
    %30 = vector.extract_strided_slice %28 {offsets = [0, 16], sizes = [16, 16], strides = [1, 1]} : vector<16x48xf32> to vector<16x16xf32>
    %31 = vector.extract_strided_slice %28 {offsets = [0, 32], sizes = [16, 16], strides = [1, 1]} : vector<16x48xf32> to vector<16x16xf32>
    %32 = tpu.iota {dimensions = array<i32: 1>} : vector<16x16xi32>
    %c9_i32 = arith.constant 9 : i32
    %33 = vector.broadcast %c9_i32 : i32 to vector<16x16xi32>
    %34 = arith.cmpi slt, %32, %33 : vector<16x16xi32>
    %35 = vector.extract_strided_slice %29 {offsets = [0, 0], sizes = [16, 8], strides = [1, 1]} : vector<16x16xf32> to vector<16x8xf32>
    %36 = vector.extract_strided_slice %30 {offsets = [0, 0], sizes = [16, 8], strides = [1, 1]} : vector<16x16xf32> to vector<16x8xf32>
    %37 = vector.extract_strided_slice %31 {offsets = [0, 0], sizes = [16, 8], strides = [1, 1]} : vector<16x16xf32> to vector<16x8xf32>
    %38 = arith.truncf %35 : vector<16x8xf32> to vector<16x8xbf16>
    %39 = arith.truncf %36 : vector<16x8xf32> to vector<16x8xbf16>
    %cst_13 = arith.constant dense<0.000000e+00> : vector<16x16xf32>
    %40 = tpu.matmul %38, %39, %cst_13 {dimension_numbers = #tpu.dot_dimension_numbers<[1], [1], [0], [0], [0, 0, 1, 0], [], []>} : vector<16x8xbf16>, vector<16x8xbf16>, vector<16x16xf32> -> vector<16x16xf32>
    %cst_14 = arith.constant 0.353553385 : f32
    %41 = vector.broadcast %cst_14 : f32 to vector<16x16xf32>
    %42 = arith.mulf %40, %41 : vector<16x16xf32>
    %cst_15 = arith.constant -1.000000e+30 : f32
    %43 = vector.broadcast %cst_15 : f32 to vector<16x16xf32>
    %44 = arith.select %34, %42, %43 : vector<16x16xi1>, vector<16x16xf32>
    %cst_16 = arith.constant dense<0xFF800000> : vector<16xf32>
    %45 = vector.multi_reduction <maximumf>, %44, %cst_16 [1] : vector<16x16xf32> to vector<16xf32>
    %46 = vector.shape_cast %45 : vector<16xf32> to vector<16x1xf32>
    %47 = vector.broadcast %46 : vector<16x1xf32> to vector<16x16xf32>
    %48 = arith.subf %44, %47 : vector<16x16xf32>
    %49 = math.exp %48 : vector<16x16xf32>
    %cst_17 = arith.constant dense<0.000000e+00> : vector<16xf32>
    %50 = vector.multi_reduction <add>, %49, %cst_17 [1] : vector<16x16xf32> to vector<16xf32>
    %51 = vector.shape_cast %50 : vector<16xf32> to vector<16x1xf32>
    %52 = tpu.reciprocal %51 {approx = true} : vector<16x1xf32> -> vector<16x1xf32>
    %53 = vector.broadcast %52 : vector<16x1xf32> to vector<16x16xf32>
    %54 = arith.mulf %49, %53 : vector<16x16xf32>
    %55 = arith.truncf %54 : vector<16x16xf32> to vector<16x16xbf16>
    %56 = arith.truncf %37 : vector<16x8xf32> to vector<16x8xbf16>
    %cst_18 = arith.constant dense<0.000000e+00> : vector<16x8xf32>
    %57 = tpu.matmul %55, %56, %cst_18 {dimension_numbers = #tpu.dot_dimension_numbers<[1], [0], [0], [1], [0, 0, 1, 1], [], []>} : vector<16x16xbf16>, vector<16x8xbf16>, vector<16x8xf32> -> vector<16x8xf32>
    %58 = vector.extract_strided_slice %29 {offsets = [0, 8], sizes = [16, 8], strides = [1, 1]} : vector<16x16xf32> to vector<16x8xf32>
    %59 = vector.extract_strided_slice %30 {offsets = [0, 8], sizes = [16, 8], strides = [1, 1]} : vector<16x16xf32> to vector<16x8xf32>
    %60 = vector.extract_strided_slice %31 {offsets = [0, 8], sizes = [16, 8], strides = [1, 1]} : vector<16x16xf32> to vector<16x8xf32>
    %61 = arith.truncf %58 : vector<16x8xf32> to vector<16x8xbf16>
    %62 = arith.truncf %59 : vector<16x8xf32> to vector<16x8xbf16>
    %cst_19 = arith.constant dense<0.000000e+00> : vector<16x16xf32>
    %63 = tpu.matmul %61, %62, %cst_19 {dimension_numbers = #tpu.dot_dimension_numbers<[1], [1], [0], [0], [0, 0, 1, 0], [], []>} : vector<16x8xbf16>, vector<16x8xbf16>, vector<16x16xf32> -> vector<16x16xf32>
    %cst_20 = arith.constant 0.353553385 : f32
    %64 = vector.broadcast %cst_20 : f32 to vector<16x16xf32>
    %65 = arith.mulf %63, %64 : vector<16x16xf32>
    %cst_21 = arith.constant -1.000000e+30 : f32
    %66 = vector.broadcast %cst_21 : f32 to vector<16x16xf32>
    %67 = arith.select %34, %65, %66 : vector<16x16xi1>, vector<16x16xf32>
    %cst_22 = arith.constant dense<0xFF800000> : vector<16xf32>
    %68 = vector.multi_reduction <maximumf>, %67, %cst_22 [1] : vector<16x16xf32> to vector<16xf32>
    %69 = vector.shape_cast %68 : vector<16xf32> to vector<16x1xf32>
    %70 = vector.broadcast %69 : vector<16x1xf32> to vector<16x16xf32>
    %71 = arith.subf %67, %70 : vector<16x16xf32>
    %72 = math.exp %71 : vector<16x16xf32>
    %cst_23 = arith.constant dense<0.000000e+00> : vector<16xf32>
    %73 = vector.multi_reduction <add>, %72, %cst_23 [1] : vector<16x16xf32> to vector<16xf32>
    %74 = vector.shape_cast %73 : vector<16xf32> to vector<16x1xf32>
    %75 = tpu.reciprocal %74 {approx = true} : vector<16x1xf32> -> vector<16x1xf32>
    %76 = vector.broadcast %75 : vector<16x1xf32> to vector<16x16xf32>
    %77 = arith.mulf %72, %76 : vector<16x16xf32>
    %78 = arith.truncf %77 : vector<16x16xf32> to vector<16x16xbf16>
    %79 = arith.truncf %60 : vector<16x8xf32> to vector<16x8xbf16>
    %cst_24 = arith.constant dense<0.000000e+00> : vector<16x8xf32>
    %80 = tpu.matmul %78, %79, %cst_24 {dimension_numbers = #tpu.dot_dimension_numbers<[1], [0], [0], [1], [0, 0, 1, 1], [], []>} : vector<16x16xbf16>, vector<16x8xbf16>, vector<16x8xf32> -> vector<16x8xf32>
    %81 = tpu.concatenate %57, %80 in 1 : vector<16x8xf32>, vector<16x8xf32> -> vector<16x16xf32>
    %82 = arith.truncf %81 : vector<16x16xf32> to vector<16x16xbf16>
    %c0_25 = arith.constant 0 : index
    %c0_26 = arith.constant 0 : index
    %83 = vector.load %arg5[%c0_25, %c0_26] : memref<16x32xbf16, #tpu.memory_space<vmem>>, vector<16x32xbf16>
    %cst_27 = arith.constant dense<0.000000e+00> : vector<16x32xf32>
    %84 = tpu.matmul %82, %83, %cst_27 {dimension_numbers = #tpu.dot_dimension_numbers<[1], [0], [0], [1], [0, 0, 1, 1], [], []>} : vector<16x16xbf16>, vector<16x32xbf16>, vector<16x32xf32> -> vector<16x32xf32>
    %c0_28 = arith.constant 0 : index
    %c0_29 = arith.constant 0 : index
    %85 = vector.load %arg6[%c0_28, %c0_29] : memref<1x32xf32, #tpu.memory_space<vmem>>, vector<1x32xf32>
    %86 = vector.broadcast %85 : vector<1x32xf32> to vector<16x32xf32>
    %87 = arith.addf %84, %86 : vector<16x32xf32>
    %88 = arith.addf %1, %87 : vector<16x32xf32>
    %c0_30 = arith.constant 0 : index
    %c0_31 = arith.constant 0 : index
    %89 = vector.load %arg7[%c0_30, %c0_31] : memref<1x32xf32, #tpu.memory_space<vmem>>, vector<1x32xf32>
    %c0_32 = arith.constant 0 : index
    %c0_33 = arith.constant 0 : index
    %90 = vector.load %arg8[%c0_32, %c0_33] : memref<1x32xf32, #tpu.memory_space<vmem>>, vector<1x32xf32>
    %cst_34 = arith.constant dense<0.000000e+00> : vector<16xf32>
    %91 = vector.multi_reduction <add>, %88, %cst_34 [1] : vector<16x32xf32> to vector<16xf32>
    %92 = vector.shape_cast %91 : vector<16xf32> to vector<16x1xf32>
    %cst_35 = arith.constant 3.200000e+01 : f32
    %93 = vector.broadcast %cst_35 : f32 to vector<16x1xf32>
    %94 = arith.divf %92, %93 : vector<16x1xf32>
    %95 = vector.broadcast %94 : vector<16x1xf32> to vector<16x32xf32>
    %96 = arith.subf %88, %95 : vector<16x32xf32>
    %97 = arith.mulf %96, %96 : vector<16x32xf32>
    %cst_36 = arith.constant dense<0.000000e+00> : vector<16xf32>
    %98 = vector.multi_reduction <add>, %97, %cst_36 [1] : vector<16x32xf32> to vector<16xf32>
    %99 = vector.shape_cast %98 : vector<16xf32> to vector<16x1xf32>
    %cst_37 = arith.constant 3.200000e+01 : f32
    %100 = vector.broadcast %cst_37 : f32 to vector<16x1xf32>
    %101 = arith.divf %99, %100 : vector<16x1xf32>
    %102 = vector.broadcast %94 : vector<16x1xf32> to vector<16x32xf32>
    %103 = arith.subf %88, %102 : vector<16x32xf32>
    %cst_38 = arith.constant 9.99999974E-6 : f32
    %104 = vector.broadcast %cst_38 : f32 to vector<16x1xf32>
    %105 = arith.addf %101, %104 : vector<16x1xf32>
    %106 = math.rsqrt %105 : vector<16x1xf32>
    %107 = vector.broadcast %106 : vector<16x1xf32> to vector<16x32xf32>
    %108 = arith.mulf %103, %107 : vector<16x32xf32>
    %109 = vector.broadcast %89 : vector<1x32xf32> to vector<16x32xf32>
    %110 = arith.mulf %108, %109 : vector<16x32xf32>
    %111 = vector.broadcast %90 : vector<1x32xf32> to vector<16x32xf32>
    %112 = arith.addf %110, %111 : vector<16x32xf32>
    %113 = arith.truncf %112 : vector<16x32xf32> to vector<16x32xbf16>
    %c0_39 = arith.constant 0 : index
    %c0_40 = arith.constant 0 : index
    %114 = vector.load %arg9[%c0_39, %c0_40] : memref<32x64xbf16, #tpu.memory_space<vmem>>, vector<32x64xbf16>
    %cst_41 = arith.constant dense<0.000000e+00> : vector<16x64xf32>
    %115 = tpu.matmul %113, %114, %cst_41 {dimension_numbers = #tpu.dot_dimension_numbers<[1], [0], [0], [1], [0, 0, 1, 1], [], []>} : vector<16x32xbf16>, vector<32x64xbf16>, vector<16x64xf32> -> vector<16x64xf32>
    %c0_42 = arith.constant 0 : index
    %c0_43 = arith.constant 0 : index
    %116 = vector.load %arg10[%c0_42, %c0_43] : memref<1x64xf32, #tpu.memory_space<vmem>>, vector<1x64xf32>
    %117 = vector.broadcast %116 : vector<1x64xf32> to vector<16x64xf32>
    %118 = arith.addf %115, %117 : vector<16x64xf32>
    %cst_44 = arith.constant 5.000000e-01 : f32
    %119 = vector.broadcast %cst_44 : f32 to vector<16x64xf32>
    %120 = arith.mulf %119, %118 : vector<16x64xf32>
    %cst_45 = arith.constant 0.707106769 : f32
    %121 = vector.broadcast %cst_45 : f32 to vector<16x64xf32>
    %122 = arith.mulf %118, %121 : vector<16x64xf32>
    %123 = math.absf %122 : vector<16x64xf32>
    %cst_46 = arith.constant 0.327591091 : f32
    %124 = vector.broadcast %cst_46 : f32 to vector<16x64xf32>
    %125 = arith.mulf %124, %123 : vector<16x64xf32>
    %cst_47 = arith.constant 1.000000e+00 : f32
    %126 = vector.broadcast %cst_47 : f32 to vector<16x64xf32>
    %127 = arith.addf %126, %125 : vector<16x64xf32>
    %cst_48 = arith.constant 1.000000e+00 : f32
    %128 = vector.broadcast %cst_48 : f32 to vector<16x64xf32>
    %129 = arith.divf %128, %127 : vector<16x64xf32>
    %cst_49 = arith.constant 1.06140542 : f32
    %130 = vector.broadcast %cst_49 : f32 to vector<16x64xf32>
    %131 = arith.mulf %130, %129 : vector<16x64xf32>
    %cst_50 = arith.constant -1.45315206 : f32
    %132 = vector.broadcast %cst_50 : f32 to vector<16x64xf32>
    %133 = arith.addf %131, %132 : vector<16x64xf32>
    %134 = arith.mulf %133, %129 : vector<16x64xf32>
    %cst_51 = arith.constant 1.42141378 : f32
    %135 = vector.broadcast %cst_51 : f32 to vector<16x64xf32>
    %136 = arith.addf %134, %135 : vector<16x64xf32>
    %137 = arith.mulf %136, %129 : vector<16x64xf32>
    %cst_52 = arith.constant -0.284496725 : f32
    %138 = vector.broadcast %cst_52 : f32 to vector<16x64xf32>
    %139 = arith.addf %137, %138 : vector<16x64xf32>
    %140 = arith.mulf %139, %129 : vector<16x64xf32>
    %cst_53 = arith.constant 0.254829586 : f32
    %141 = vector.broadcast %cst_53 : f32 to vector<16x64xf32>
    %142 = arith.addf %140, %141 : vector<16x64xf32>
    %143 = arith.mulf %142, %129 : vector<16x64xf32>
    %cst_54 = arith.constant 0.000000e+00 : f32
    %144 = vector.broadcast %cst_54 : f32 to vector<16x64xf32>
    %145 = arith.subf %144, %123 : vector<16x64xf32>
    %146 = arith.mulf %145, %123 : vector<16x64xf32>
    %147 = math.exp %146 : vector<16x64xf32>
    %148 = arith.mulf %143, %147 : vector<16x64xf32>
    %cst_55 = arith.constant 1.000000e+00 : f32
    %149 = vector.broadcast %cst_55 : f32 to vector<16x64xf32>
    %150 = arith.subf %149, %148 : vector<16x64xf32>
    %cst_56 = arith.constant 0.000000e+00 : f32
    %151 = vector.broadcast %cst_56 : f32 to vector<16x64xf32>
    %152 = arith.cmpf oge, %122, %151 : vector<16x64xf32>
    %cst_57 = arith.constant 0.000000e+00 : f32
    %153 = vector.broadcast %cst_57 : f32 to vector<16x64xf32>
    %154 = arith.subf %153, %150 : vector<16x64xf32>
    %155 = arith.select %152, %150, %154 : vector<16x64xi1>, vector<16x64xf32>
    %cst_58 = arith.constant 1.000000e+00 : f32
    %156 = vector.broadcast %cst_58 : f32 to vector<16x64xf32>
    %157 = arith.addf %156, %155 : vector<16x64xf32>
    %158 = arith.mulf %120, %157 : vector<16x64xf32>
    %159 = arith.truncf %158 : vector<16x64xf32> to vector<16x64xbf16>
    %c0_59 = arith.constant 0 : index
    %c0_60 = arith.constant 0 : index
    %160 = vector.load %arg11[%c0_59, %c0_60] : memref<64x32xbf16, #tpu.memory_space<vmem>>, vector<64x32xbf16>
    %cst_61 = arith.constant dense<0.000000e+00> : vector<16x32xf32>
    %161 = tpu.matmul %159, %160, %cst_61 {dimension_numbers = #tpu.dot_dimension_numbers<[1], [0], [0], [1], [0, 0, 1, 1], [], []>} : vector<16x64xbf16>, vector<64x32xbf16>, vector<16x32xf32> -> vector<16x32xf32>
    %c0_62 = arith.constant 0 : index
    %c0_63 = arith.constant 0 : index
    %162 = vector.load %arg12[%c0_62, %c0_63] : memref<1x32xf32, #tpu.memory_space<vmem>>, vector<1x32xf32>
    %163 = vector.broadcast %162 : vector<1x32xf32> to vector<16x32xf32>
    %164 = arith.addf %161, %163 : vector<16x32xf32>
    %165 = arith.addf %88, %164 : vector<16x32xf32>
    %c0_64 = arith.constant 0 : index
    %c0_65 = arith.constant 0 : index
    %c0_66 = arith.constant 0 : index
    %166 = vector.load %arg13[%c0_64, %c0_65, %c0_66] : memref<1x16x32xf32, #tpu.memory_space<vmem>>, vector<1x16x32xf32>
    %167 = vector.shape_cast %166 : vector<1x16x32xf32> to vector<16x32xf32>
    %168 = vector.shape_cast %165 : vector<16x32xf32> to vector<1x16x32xf32>
    tpu.vector_store %arg13[%c0_64, %c0_65, %c0_66], %168 {strides = array<i32>} : memref<1x16x32xf32, #tpu.memory_space<vmem>>, vector<1x16x32xf32>,
    return
  }
  func.func @transform_0(%arg0: i32) -> (i32, i32, i32) {
    %c0_i32 = arith.constant 0 : i32
    %c0_i32_0 = arith.constant 0 : i32
    %c0_i32_1 = arith.constant 0 : i32
    return %arg0, %c0_i32, %c0_i32_0 : i32, i32, i32
  }
  func.func @transform_1(%arg0: i32) -> (i32, i32) {
    %c0_i32 = arith.constant 0 : i32
    %c0_i32_0 = arith.constant 0 : i32
    %c0_i32_1 = arith.constant 0 : i32
    return %c0_i32, %c0_i32_0 : i32, i32
  }
  func.func @transform_2(%arg0: i32) -> (i32, i32) {
    %c0_i32 = arith.constant 0 : i32
    %c0_i32_0 = arith.constant 0 : i32
    %c0_i32_1 = arith.constant 0 : i32
    return %c0_i32, %c0_i32_0 : i32, i32
  }
  func.func @transform_3(%arg0: i32) -> (i32, i32) {
    %c0_i32 = arith.constant 0 : i32
    %c0_i32_0 = arith.constant 0 : i32
    %c0_i32_1 = arith.constant 0 : i32
    return %c0_i32, %c0_i32_0 : i32, i32
  }
  func.func @transform_4(%arg0: i32) -> (i32, i32) {
    %c0_i32 = arith.constant 0 : i32
    %c0_i32_0 = arith.constant 0 : i32
    %c0_i32_1 = arith.constant 0 : i32
    return %c0_i32, %c0_i32_0 : i32, i32
  }
  func.func @transform_5(%arg0: i32) -> (i32, i32) {
    %c0_i32 = arith.constant 0 : i32
    %c0_i32_0 = arith.constant 0 : i32
    %c0_i32_1 = arith.constant 0 : i32
    return %c0_i32, %c0_i32_0 : i32, i32
  }
  func.func @transform_6(%arg0: i32) -> (i32, i32) {
    %c0_i32 = arith.constant 0 : i32
    %c0_i32_0 = arith.constant 0 : i32
    %c0_i32_1 = arith.constant 0 : i32
    return %c0_i32, %c0_i32_0 : i32, i32
  }
  func.func @transform_7(%arg0: i32) -> (i32, i32) {
    %c0_i32 = arith.constant 0 : i32
    %c0_i32_0 = arith.constant 0 : i32
    %c0_i32_1 = arith.constant 0 : i32
    return %c0_i32, %c0_i32_0 : i32, i32
  }
  func.func @transform_8(%arg0: i32) -> (i32, i32) {
    %c0_i32 = arith.constant 0 : i32
    %c0_i32_0 = arith.constant 0 : i32
    %c0_i32_1 = arith.constant 0 : i32
    return %c0_i32, %c0_i32_0 : i32, i32
  }
  func.func @transform_9(%arg0: i32) -> (i32, i32) {
    %c0_i32 = arith.constant 0 : i32
    %c0_i32_0 = arith.constant 0 : i32
    %c0_i32_1 = arith.constant 0 : i32
    return %c0_i32, %c0_i32_0 : i32, i32
  }
  func.func @transform_10(%arg0: i32) -> (i32, i32) {
    %c0_i32 = arith.constant 0 : i32
    %c0_i32_0 = arith.constant 0 : i32
    %c0_i32_1 = arith.constant 0 : i32
    return %c0_i32, %c0_i32_0 : i32, i32
  }
  func.func @transform_11(%arg0: i32) -> (i32, i32) {
    %c0_i32 = arith.constant 0 : i32
    %c0_i32_0 = arith.constant 0 : i32
    %c0_i32_1 = arith.constant 0 : i32
    return %c0_i32, %c0_i32_0 : i32, i32
  }
  func.func @transform_12(%arg0: i32) -> (i32, i32, i32) {
    %c0_i32 = arith.constant 0 : i32
    %c0_i32_0 = arith.constant 0 : i32
    %c0_i32_1 = arith.constant 0 : i32
    return %arg0, %c0_i32, %c0_i32_0 : i32, i32, i32
  }
}

module attributes {stable_mosaic.version = 11 : i64} {
  func.func @_head_kernel(%arg0: i32, %arg1: memref<2x32xf32, #tpu.memory_space<vmem>>, %arg2: memref<1x32xf32, #tpu.memory_space<vmem>>, %arg3: memref<1x32xf32, #tpu.memory_space<vmem>>, %arg4: memref<32x4xbf16, #tpu.memory_space<vmem>>, %arg5: memref<1x4xf32, #tpu.memory_space<vmem>>, %arg6: memref<2x4xf32, #tpu.memory_space<vmem>>) attributes {dimension_semantics = [#tpu.dimension_semantics<arbitrary>], iteration_bounds = array<i64: 1>, scalar_prefetch = 0 : i64, scratch_operands = 0 : i64, tpu.core_type = #tpu.core_type<tc>, window_params = [{pipeline_mode = #tpu.pipeline_mode<synchronous>, transform_indices = @transform_0, window_bounds = array<i64: 2, 32>}, {pipeline_mode = #tpu.pipeline_mode<synchronous>, transform_indices = @transform_1, window_bounds = array<i64: 1, 32>}, {pipeline_mode = #tpu.pipeline_mode<synchronous>, transform_indices = @transform_2, window_bounds = array<i64: 1, 32>}, {pipeline_mode = #tpu.pipeline_mode<synchronous>, transform_indices = @transform_3, window_bounds = array<i64: 32, 4>}, {pipeline_mode = #tpu.pipeline_mode<synchronous>, transform_indices = @transform_4, window_bounds = array<i64: 1, 4>}, {pipeline_mode = #tpu.pipeline_mode<synchronous>, transform_indices = @transform_5, window_bounds = array<i64: 2, 4>}]} {
    %c0 = arith.constant 0 : index
    %c0_0 = arith.constant 0 : index
    %0 = vector.load %arg1[%c0, %c0_0] : memref<2x32xf32, #tpu.memory_space<vmem>>, vector<2x32xf32>
    %c0_1 = arith.constant 0 : index
    %c0_2 = arith.constant 0 : index
    %1 = vector.load %arg2[%c0_1, %c0_2] : memref<1x32xf32, #tpu.memory_space<vmem>>, vector<1x32xf32>
    %c0_3 = arith.constant 0 : index
    %c0_4 = arith.constant 0 : index
    %2 = vector.load %arg3[%c0_3, %c0_4] : memref<1x32xf32, #tpu.memory_space<vmem>>, vector<1x32xf32>
    %cst = arith.constant dense<0.000000e+00> : vector<2xf32>
    %3 = vector.multi_reduction <add>, %0, %cst [1] : vector<2x32xf32> to vector<2xf32>
    %4 = vector.shape_cast %3 : vector<2xf32> to vector<2x1xf32>
    %cst_5 = arith.constant 3.200000e+01 : f32
    %5 = vector.broadcast %cst_5 : f32 to vector<2x1xf32>
    %6 = arith.divf %4, %5 : vector<2x1xf32>
    %7 = vector.broadcast %6 : vector<2x1xf32> to vector<2x32xf32>
    %8 = arith.subf %0, %7 : vector<2x32xf32>
    %9 = arith.mulf %8, %8 : vector<2x32xf32>
    %cst_6 = arith.constant dense<0.000000e+00> : vector<2xf32>
    %10 = vector.multi_reduction <add>, %9, %cst_6 [1] : vector<2x32xf32> to vector<2xf32>
    %11 = vector.shape_cast %10 : vector<2xf32> to vector<2x1xf32>
    %cst_7 = arith.constant 3.200000e+01 : f32
    %12 = vector.broadcast %cst_7 : f32 to vector<2x1xf32>
    %13 = arith.divf %11, %12 : vector<2x1xf32>
    %14 = vector.broadcast %6 : vector<2x1xf32> to vector<2x32xf32>
    %15 = arith.subf %0, %14 : vector<2x32xf32>
    %cst_8 = arith.constant 9.99999974E-6 : f32
    %16 = vector.broadcast %cst_8 : f32 to vector<2x1xf32>
    %17 = arith.addf %13, %16 : vector<2x1xf32>
    %18 = math.rsqrt %17 : vector<2x1xf32>
    %19 = vector.broadcast %18 : vector<2x1xf32> to vector<2x32xf32>
    %20 = arith.mulf %15, %19 : vector<2x32xf32>
    %21 = vector.broadcast %1 : vector<1x32xf32> to vector<2x32xf32>
    %22 = arith.mulf %20, %21 : vector<2x32xf32>
    %23 = vector.broadcast %2 : vector<1x32xf32> to vector<2x32xf32>
    %24 = arith.addf %22, %23 : vector<2x32xf32>
    %25 = arith.truncf %24 : vector<2x32xf32> to vector<2x32xbf16>
    %c0_9 = arith.constant 0 : index
    %c0_10 = arith.constant 0 : index
    %26 = vector.load %arg4[%c0_9, %c0_10] : memref<32x4xbf16, #tpu.memory_space<vmem>>, vector<32x4xbf16>
    %cst_11 = arith.constant dense<0.000000e+00> : vector<2x4xf32>
    %27 = tpu.matmul %25, %26, %cst_11 {dimension_numbers = #tpu.dot_dimension_numbers<[1], [0], [0], [1], [0, 0, 1, 1], [], []>} : vector<2x32xbf16>, vector<32x4xbf16>, vector<2x4xf32> -> vector<2x4xf32>
    %c0_12 = arith.constant 0 : index
    %c0_13 = arith.constant 0 : index
    %28 = vector.load %arg5[%c0_12, %c0_13] : memref<1x4xf32, #tpu.memory_space<vmem>>, vector<1x4xf32>
    %29 = vector.broadcast %28 : vector<1x4xf32> to vector<2x4xf32>
    %30 = arith.addf %27, %29 : vector<2x4xf32>
    %c0_14 = arith.constant 0 : index
    %c0_15 = arith.constant 0 : index
    %31 = vector.load %arg6[%c0_14, %c0_15] : memref<2x4xf32, #tpu.memory_space<vmem>>, vector<2x4xf32>
    tpu.vector_store %arg6[%c0_14, %c0_15], %30 {strides = array<i32>} : memref<2x4xf32, #tpu.memory_space<vmem>>, vector<2x4xf32>,
    return
  }
  func.func @transform_0(%arg0: i32) -> (i32, i32) {
    %c0_i32 = arith.constant 0 : i32
    %c0_i32_0 = arith.constant 0 : i32
    %c0_i32_1 = arith.constant 0 : i32
    return %c0_i32, %c0_i32_0 : i32, i32
  }
  func.func @transform_1(%arg0: i32) -> (i32, i32) {
    %c0_i32 = arith.constant 0 : i32
    %c0_i32_0 = arith.constant 0 : i32
    %c0_i32_1 = arith.constant 0 : i32
    return %c0_i32, %c0_i32_0 : i32, i32
  }
  func.func @transform_2(%arg0: i32) -> (i32, i32) {
    %c0_i32 = arith.constant 0 : i32
    %c0_i32_0 = arith.constant 0 : i32
    %c0_i32_1 = arith.constant 0 : i32
    return %c0_i32, %c0_i32_0 : i32, i32
  }
  func.func @transform_3(%arg0: i32) -> (i32, i32) {
    %c0_i32 = arith.constant 0 : i32
    %c0_i32_0 = arith.constant 0 : i32
    %c0_i32_1 = arith.constant 0 : i32
    return %c0_i32, %c0_i32_0 : i32, i32
  }
  func.func @transform_4(%arg0: i32) -> (i32, i32) {
    %c0_i32 = arith.constant 0 : i32
    %c0_i32_0 = arith.constant 0 : i32
    %c0_i32_1 = arith.constant 0 : i32
    return %c0_i32, %c0_i32_0 : i32, i32
  }
  func.func @transform_5(%arg0: i32) -> (i32, i32) {
    %c0_i32 = arith.constant 0 : i32
    %c0_i32_0 = arith.constant 0 : i32
    %c0_i32_1 = arith.constant 0 : i32
    return %c0_i32, %c0_i32_0 : i32, i32
  }
}

</mosaic_0001>

<bundles_post_ra>
// kernel: vit_forward.4
= control target key start
LH: loop header
LB: loop body
LE: loop exit
PB: predicated region body
PF: predicated region fallthrough
CT: control target
= control target key end

     0   :  { %vm372_vm0 = vcmask 261120   ;;  %s637_s1 = inlined_call_operand.vmem [shape: bf16[512,32], index: 1, kind: input, shape index: {}]   ;;  %s638_s0 = inlined_call_operand.vmem [shape: f32[16,512], index: 0, kind: input, shape index: {}]   ;;  %s639_s2 = inlined_call_operand.vmem [shape: f32[1,32], index: 2, kind: input, shape index: {}]   ;;  %s640_s3 = inlined_call_operand.vmem [shape: f32[16,32], index: 3, kind: output, shape index: {}]  }
   0x1   :  { %v456_v0 = vld [vmem:[%s637_s1 + $0x40] sm:$0xff]   ;;  %v460_v4 = vld [vmem:[%s637_s1 + $0x48] sm:$0xff]   ;;  %v464_v8 = vld [vmem:[%s637_s1 + $0x50] sm:$0xff]  }
   0x2   :  { %v457_v1 = vld [vmem:[%s637_s1 + $0xc0] sm:$0xff]   ;;  %412 = vmatprep.subr.bf16.mxu0 %v456_v0  ;;  %v461_v5 = vld [vmem:[%s637_s1 + $0xc8] sm:$0xff]   ;;  %v465_v9 = vld [vmem:[%s637_s1 + $0xd0] sm:$0xff]  }
   0x3   :  { %v458_v2 = vld [vmem:[%s637_s1] sm:$0xff]   ;;  %434 = vmatprep.subr.bf16.mxu1 %v457_v1  ;;  %v462_v6 = vld [vmem:[%s637_s1 + $0x8] sm:$0xff]   ;;  %v466_v10 = vld [vmem:[%s637_s1 + $0x10] sm:$0xff]  }
   0x4   :  { %v459_v3 = vld [vmem:[%s637_s1 + $0x80] sm:$0xff]   ;;  %413 = vmatpush3.bf16.msra.mxu0 %v458_v2  ;;  %v463_v7 = vld [vmem:[%s637_s1 + $0x88] sm:$0xff]   ;;  %v467_v11 = vld [vmem:[%s637_s1 + $0x90] sm:$0xff]  }
   0x5   :  { %435 = vmatpush3.bf16.msra.mxu1 %v459_v3  ;;  %414 = vmatprep.subr.bf16.mxu0 %v460_v4  ;;  %v468_v12 = vld [vmem:[%s637_s1 + $0x58] sm:$0xff]   ;;  %v472_v16 = vld [vmem:[%s637_s1 + $0x60] sm:$0xff]   ;;  %v476_v20 = vld [vmem:[%s637_s1 + $0x68] sm:$0xff]  }
   0x6   :  { %436 = vmatprep.subr.bf16.mxu1 %v461_v5  ;;  %v469_v13 = vld [vmem:[%s637_s1 + $0xd8] sm:$0xff]   ;;  %v473_v17 = vld [vmem:[%s637_s1 + $0xe0] sm:$0xff]   ;;  %v477_v21 = vld [vmem:[%s637_s1 + $0xe8] sm:$0xff]  }
   0x7   :  { %v470_v14 = vld [vmem:[%s637_s1 + $0x18] sm:$0xff]   ;;  %v474_v18 = vld [vmem:[%s637_s1 + $0x20] sm:$0xff]   ;;  %v478_v22 = vld [vmem:[%s637_s1 + $0x28] sm:$0xff]  }
   0x8   :  { %415 = vmatpush3.bf16.msra.mxu0 %v462_v6  ;;  %v471_v15 = vld [vmem:[%s637_s1 + $0x98] sm:$0xff]   ;;  %v475_v19 = vld [vmem:[%s637_s1 + $0xa0] sm:$0xff]   ;;  %v479_v23 = vld [vmem:[%s637_s1 + $0xa8] sm:$0xff]  }
   0x9   :  { %437 = vmatpush3.bf16.msra.mxu1 %v463_v7  ;;  %416 = vmatprep.subr.bf16.mxu0 %v464_v8  ;;  %v480_v24 = vld [vmem:[%s637_s1 + $0x70] sm:$0xff]   ;;  %v484_v28 = vld [vmem:[%s637_s1 + $0x78] sm:$0xff]   ;;  %v16_v32 = vld [vmem:[%s638_s0 + $0x8] sm:$0xff] }
   0xa   :  { %438 = vmatprep.subr.bf16.mxu1 %v465_v9  ;;  %v481_v25 = vld [vmem:[%s637_s1 + $0xf0] sm:$0xff]   ;;  %v485_v29 = vld [vmem:[%s637_s1 + $0xf8] sm:$0xff]   ;;  %v20_v33 = vld [vmem:[%s638_s0 + $0x28] sm:$0xff] }
   0xb   :  { %v482_v26 = vld [vmem:[%s637_s1 + $0x30] sm:$0xff]   ;;  %v486_v30 = vld [vmem:[%s637_s1 + $0x38] sm:$0xff]   ;;  %v24_v35 = vpack.c.bf16 %v20_v33, %v16_v32  ;;  %v15_v37 = vld [vmem:[%s638_s0] sm:$0xff] }
   0xc   :  { %417 = vmatpush3.bf16.msra.mxu0 %v466_v10  ;;  %v483_v27 = vld [vmem:[%s637_s1 + $0xb0] sm:$0xff]   ;;  %v487_v31 = vld [vmem:[%s637_s1 + $0xb8] sm:$0xff]   ;;  %v19_v38 = vld [vmem:[%s638_s0 + $0x20] sm:$0xff] }
   0xd   :  { %439 = vmatpush3.bf16.msra.mxu1 %v467_v11  ;;  %418 = vmatprep.subr.bf16.mxu0 %v468_v12  ;;  %v18_v34 = vld [vmem:[%s638_s0 + $0x18] sm:$0xff]  ;;  %v23_v40 = vpack.c.bf16 %v19_v38, %v15_v37  ;;  %v17_v41 = vld [vmem:[%s638_s0 + $0x10] sm:$0xff]  ;;  %v379_v46 = vld [vmem:[%s639_s2] ss:$0 sm:$0xff] }
   0xe   :  { %440 = vmatprep.subr.bf16.mxu1 %v469_v13  ;;  %v22_v36 = vld [vmem:[%s638_s0 + $0x38] sm:$0xff]  ;;  %v21_v42 = vld [vmem:[%s638_s0 + $0x30] sm:$0xff]  ;;  %322 = vmatprep.mubr.bf16.mxu0 %v24_v35 }
   0xf   :  { %v26_v39 = vpack.c.bf16 %v22_v36, %v18_v34  ;;  %v25_v43 = vpack.c.bf16 %v21_v42, %v17_v41 }
  0x10   :  { %419 = vmatpush3.bf16.msra.mxu0 %v470_v14 }
  0x11   :  { %441 = vmatpush3.bf16.msra.mxu1 %v471_v15  ;;  %420 = vmatprep.subr.bf16.mxu0 %v472_v16 }
  0x12   :  { %442 = vmatprep.subr.bf16.mxu1 %v473_v17  ;;  %363 = vmatprep.mubr.bf16.mxu1 %v26_v39 }
  0x14   :  { %421 = vmatpush3.bf16.msra.mxu0 %v474_v18 }
  0x15   :  { %443 = vmatpush3.bf16.msra.mxu1 %v475_v19  ;;  %422 = vmatprep.subr.bf16.mxu0 %v476_v20 }
  0x16   :  { %444 = vmatprep.subr.bf16.mxu1 %v477_v21 }
  0x18   :  { %423 = vmatpush3.bf16.msra.mxu0 %v478_v22 }
  0x19   :  { %445 = vmatpush3.bf16.msra.mxu1 %v479_v23  ;;  %424 = vmatprep.subr.bf16.mxu0 %v480_v24 }
  0x1a   :  { %446 = vmatprep.subr.bf16.mxu1 %v481_v25 }
  0x1c   :  { %425 = vmatpush3.bf16.msra.mxu0 %v482_v26 }
  0x1d   :  { %447 = vmatpush3.bf16.msra.mxu1 %v483_v27  ;;  %426 = vmatprep.subr.bf16.mxu0 %v484_v28 }
  0x1e   :  { %448 = vmatprep.subr.bf16.mxu1 %v485_v29 }
  0x20   :  { %427 = vmatpush3.bf16.msra.mxu0 %v486_v30 }
  0x21   :  { %449 = vmatpush3.bf16.msra.mxu1 %v487_v31 }
  0x23   :  { %323 = vmatmul.mubr.bf16.vlgmr.msra.gmra.mrb[0].mxu0 %v23_v40 }
  0x24   :  { %364 = vmatmul.mubr.bf16.vlgmr.msra.gmra.mrb[0].mxu1 %v25_v43 }
  0xf6   :  { %v428_v44 = vpop.f32.mrb[0].mxu0 }
  0xf7   :  { %v450_v45 = vpop.f32.mrb[0].mxu1  ;;  %v429_v47 = vpop.f32.mrb[1].mxu0 }
  0xf8   :  { %v430_v48 = vadd.f32 %v429_v47, %v428_v44  ;;  %v451_v49 = vpop.f32.mrb[1].mxu1  ;;  %v431_v50 = vpop.f32.mrb[2].mxu0 }
  0xf9   :  { %v452_v51 = vadd.f32 %v451_v49, %v450_v45  ;;  %v453_v52 = vpop.f32.mrb[2].mxu1  ;;  %v432_v53 = vpop.f32.mrb[3].mxu0 }
  0xfa   :  { %v325_v54 = vadd.f32 %v430_v48, %v379_v46  ;;  %v433_v55 = vadd.f32 %v432_v53, %v431_v50  ;;  %v454_v56 = vpop.f32.mrb[3].mxu1 }
  0xfb   :  { %v455_v57 = vadd.f32 %v454_v56, %v453_v52 }
  0xfc   :  { %v366_v58 = vadd.f32 %v452_v51, %v325_v54  ;;  %v328_v59 = vadd.f32 %v433_v55, %v379_v46 }
  0xfe   :  { %373 = vst.msk [vmem:[%s640_s3] sm:$0xff] %vm372_vm0, %v366_v58  ;;  %v369_v60 = vadd.f32 %v455_v57, %v328_v59 }
 0x100   :  { %374 = vst.msk [vmem:[%s640_s3 + $0x8] sm:$0xff] %vm372_vm0, %v369_v60 }

// kernel: vit_forward.5
= control target key start
LH: loop header
LB: loop body
LE: loop exit
PB: predicated region body
PF: predicated region fallthrough
CT: control target
= control target key end

     0   :  { %s1420_s21 = smov 0   ;;  %s1582_s0 = inlined_call_operand.vmem [shape: f32[2,16,32], index: 0, kind: input, shape index: {}]   ;;  %s1583_s1 = inlined_call_operand.vmem [shape: f32[1,32], index: 1, kind: input, shape index: {}]   ;;  %s1584_s2 = inlined_call_operand.vmem [shape: f32[1,32], index: 2, kind: input, shape index: {}]   ;;  %s1585_s3 = inlined_call_operand.vmem [shape: bf16[32,48], index: 3, kind: input, shape index: {}]   ;;  %s1586_s4 = inlined_call_operand.vmem [shape: bf16[16,32], index: 4, kind: input, shape index: {}]   ;;  %s1587_s5 = inlined_call_operand.vmem [shape: f32[1,32], index: 5, kind: input, shape index: {}]   ;;  %s1588_s6 = inlined_call_operand.vmem [shape: f32[1,32], index: 6, kind: input, shape index: {}]   ;;  %s1589_s7 = inlined_call_operand.vmem [shape: f32[1,32], index: 7, kind: input, shape index: {}]   ;;  %s1590_s8 = inlined_call_operand.vmem [shape: bf16[32,64], index: 8, kind: input, shape index: {}]   ;;  %s1591_s9 = inlined_call_operand.vmem [shape: f32[1,64], index: 9, kind: input, shape index: {}]   ;;  %s1592_s10 = inlined_call_operand.vmem [shape: bf16[64,32], index: 10, kind: input, shape index: {}]   ;;  %s1593_s11 = inlined_call_operand.vmem [shape: f32[1,32], index: 11, kind: input, shape index: {}]   ;;  %s1594_s12 = inlined_call_operand.vmem [shape: f32[2,16,32], index: 12, kind: output, shape index: {}]  }
   0x1 LB: > { %s1161_s22 = sadd.s32 4294967295, %s1345_s21   ;;  %p1165_p0 = scmp.ge.s32.totalorder %s1345_s21, 1  ;;  %s1345_s21 = sphi %s1420_s21, %s22_s21  }
   0x2   : > { %p362_p1 = scmp.lt.s32.totalorder %s1345_s21, 3 }
   0x4   : > { %p363_p2 = pnand %p1165_p0, %p362_p1 }
   0x5   : > { %p404_p3 = scmp.lt.s32.totalorder (!%p363_p2), %s1161_s22, 1  ;;  %vm419_vm0 = vcmask (!%p363_p2), 261120   ;;  %v1298_v14 = vld [vmem:[%s1585_s3] sm:$0xff] (!%p363_p2)   ;;  %v1347_v15 = vmov (!%p363_p2), 0.0   ;;  %v1299_v16 = vld [vmem:[%s1585_s3 + $0x8] sm:$0xff] (!%p363_p2)   ;;  %vm1348_vm1 = vmmov (!%p363_p2), 0   ;;  %v524_v44 = vlaneseq (!%p363_p2) }
   0x6   : > { %366 = sbr.rel (%p363_p2) target bundleno = 2572 (0xa0c), region = 68  ;;  %1219 = vmatprep.subr.bf16.mxu0 (!%p363_p2), %v1347_v15  ;;  %1227 = vmatprep.subr.bf16.mxu1 (!%p363_p2), %v1347_v15  ;;  %v1170_v25 = vld [vmem:[%s1583_s1] ss:$0 sm:$0xff] (!%p363_p2)  ;;  %s1349_s17 = smov (!%p363_p2), 104   ;;  %vm531_vm2 = vcmask (!%p363_p2), 64512   ;;  %vm583_vm4 = vcmask (!%p363_p2), 130048  }
   0x7   : > { %1220 = vmatpush3.bf16.msra.mxu0 (!%p363_p2), %v1298_v14  ;;  %1223 = vmatprep.mubr.msk.bf16.mxu0 (!%p363_p2), %vm1348_vm1, %v1347_v15  ;;  %v1171_v29 = vld [vmem:[%s1584_s2] ss:$0 sm:$0xff] (!%p363_p2)  ;;  %s1350_s18 = smov (!%p363_p2), 112   ;;  %s1351_s19 = smov (!%p363_p2), 120   ;;  %v525_v45 = vand.u32 (!%p363_p2), 127, %v524_v44  ;;  %vm1057_vm7 = vcmask (!%p363_p2), 523264  }
   0x8   : > { %1221 = vmatprep.subr.bf16.mxu0 (!%p363_p2), %v1347_v15  ;;  %1229 = vmatprep.mubr.msk.bf16.mxu1 (!%p363_p2), %vm1348_vm1, %v1347_v15  ;;  %s1352_s20 = smov (!%p363_p2), 96   ;;  %s1353_s24 = smov (!%p363_p2), 88  }
   0x9   : > { %vm526_vm3 = vcmp.lt.s32.totalorder (!%p363_p2), %v525_v45, 9  ;;  %s1354_s27 = smov (!%p363_p2), 8  }
   0xb   : > { %1222 = vmatpush3.bf16.msra.mxu0 (!%p363_p2), %v1299_v16 }
   0xc   : > { %1233 = vmatprep.subr.bf16.mxu0 (!%p363_p2), %v1347_v15 }
   0xd   : > { %s1596_s22 = smov (!%p404_p3, %s1161_s22), 1 }
   0xe   : > { %s1196_s23 = sshll.u32 %s1596_s22, 4 }
   0xf   : > { %s408_s26 = scalar_lea.vmem %s1582_s0, %s1196_s23 }
  0x10   : > { %v1436_v0 = vld [vmem:[%s408_s26] sm:$0xff]  ;;  %v1438_v1 = vld [vmem:[%s408_s26 + $0x8] sm:$0xff] }
  0x11   : > { %v420_v2 = vsel %vm419_vm0, %v1436_v0, 0.0  ;;  %v423_v3 = vsel %vm419_vm0, %v1438_v1, 0.0 }
  0x12   : > { %421 = vadd.xlane.f32.xlu0 %v420_v2 }
  0x16   : > { %424 = vadd.xlane.f32.xlu0 %v423_v3 }
  0x9f   : > { %v422_v4 = vpop.xlane.xlu0 %421 }
  0xa0   : > { %v427_v5 = vmul.f32 0.03125, %v422_v4 }
  0xa2   : > { %v429_v6 = vsub.f32 %v1436_v0, %v427_v5 }
  0xa3   : > { %v425_v7 = vpop.xlane.xlu0 %424 }
  0xa4   : > { %v428_v8 = vmul.f32 0.03125, %v425_v7  ;;  %v431_v9 = vmul.f32 %v429_v6, %v429_v6 }
  0xa6   : > { %v430_v10 = vsub.f32 %v1438_v1, %v428_v8  ;;  %v433_v11 = vsel %vm419_vm0, %v431_v9, 0.0 }
  0xa7   : > { %434 = vadd.xlane.f32.xlu1 %v433_v11 }
  0xa8   : > { %v432_v12 = vmul.f32 %v430_v10, %v430_v10 }
  0xaa   : > { %v436_v13 = vsel %vm419_vm0, %v432_v12, 0.0 }
  0xab   : > { %437 = vadd.xlane.f32.xlu1 %v436_v13 }
 0x134   : > { %v435_v17 = vpop.xlane.xlu1 %434 }
 0x135   : > { %v439_v18 = vmul.f32 0.03125, %v435_v17 }
 0x137   : > { %v441_v19 = vadd.f32 1e-05, %v439_v18 }
 0x138   : > { %v438_v20 = vpop.xlane.xlu1 %437 }
 0x139   : > { %1307 = vrsqrt.f32 %v441_v19  ;;  %v440_v21 = vmul.f32 0.03125, %v438_v20 }
 0x13b   : > { %v442_v22 = vadd.f32 1e-05, %v440_v21 }
 0x13d   : > { %1309 = vrsqrt.f32 %v442_v22 }
 0x143   : > { %v1308_v23 = vpop.eup %1307 }
 0x144   : > { %v445_v24 = vmul.f32 %v1308_v23, %v429_v6 }
 0x146   : > { %v453_v28 = vmul.f32 %v1170_v25, %v445_v24 }
 0x147   : > { %v1310_v26 = vpop.eup %1309 }
 0x148   : > { %v446_v27 = vmul.f32 %v1310_v26, %v430_v10  ;;  %v461_v31 = vadd.f32 %v1171_v29, %v453_v28 }
 0x14a   : > { %v454_v30 = vmul.f32 %v1170_v25, %v446_v27 }
 0x14c   : > { %v462_v32 = vadd.f32 %v1171_v29, %v454_v30 }
 0x14e   : > { %v463_v33 = vpack.c.bf16 %v462_v32, %v461_v31 }
 0x150   : > { %1224 = vmatmul.mubr.msk.bf16.vlgmr.msra.gmra.mrb[0].mxu0 %vm419_vm0, %v463_v33 }
 0x151   : > { %1235 = vmatprep.mubr.msk.bf16.mxu0 %vm1348_vm1, %v1347_v15 }
 0x223   : > { %v517_v34 = vpop.f32.mrb[0].mxu0 }
 0x224   : > { %v1225_v35 = vpop.f32.mrb[1].mxu0 }
 0x225   : > { %v520_v36 = vpop.f32.mrb[2].mxu0 }
 0x226   : > { %v1471_v37 = vpack.c.bf16 %v520_v36, %v517_v34  ;;  %v1226_v38 = vpop.f32.mrb[3].mxu0 }
 0x228   : > { %656 = vrot.lane.b32.xlu1 %v1471_v37, %s1349_s17  ;;  %529 = vrot.lane.b32.xlu0 %v1471_v37, %s1350_s18 }
 0x22c   : > { %654 = vrot.lane.b32.xlu1 %v1471_v37, %s1351_s19  ;;  %s413_s19 = scalar_lea.vmem %s1594_s12, %s1196_s23 }
 0x29a   : > { %v530_v39 = vpop.permute.xlu0 %529  ;;  %v657_v41 = vpop.permute.xlu1 %656 }
 0x29b   : > { %v536_v40 = vsel %vm531_vm2, %v530_v39, 0  ;;  %v662_v42 = vsel %vm531_vm2, %v657_v41, 0  ;;  %v1300_v41 = vld [vmem:[%s1586_s4] sm:$0xff]  }
 0x29c   : > { %1228 = vmatpush3.bf16.xpose.msra.mxu1 %v536_v40 }
 0x29d   : > { %1239 = vmatprep.subr.bf16.mxu1 %v1347_v15 }
 0x29e   : > { %v655_v43 = vpop.permute.xlu1 %654 }
 0x2a3   : > { %1230 = vmatmul.mubr.msk.bf16.vlgmr.msra.gmra.mrb[0].mxu1 %vm531_vm2, %v1471_v37 }
 0x2a4   : > { %1240 = vmatpush3.bf16.xpose.msra.mxu1 %v662_v42  ;;  %1241 = vmatprep.mubr.msk.bf16.mxu1 %vm1348_vm1, %v1347_v15 }
 0x2a5   : > { %1251 = vmatprep.subr.bf16.mxu1 %v1347_v15 }
 0x2ab   : > { %1242 = vmatmul.mubr.msk.bf16.vlgmr.msra.gmra.mrb[4].mxu1 %vm531_vm2, %v655_v43 }
 0x2ac   : > { %1253 = vmatprep.mubr.msk.bf16.mxu1 %vm1348_vm1, %v1347_v15  ;;  %1252 = vmatpush3.bf16.msra.mxu1 %v1300_v41 }
 0x2ad   : > { %1265 = vmatprep.subr.bf16.mxu1 %v1347_v15 }
 0x376   : > { %v572_v46 = vpop.f32.mrb[0].mxu1 }
 0x377   : > { %v579_v47 = vmul.f32 0.35355338, %v572_v46  ;;  %v1231_v48 = vpop.f32.mrb[1].mxu1 }
 0x378   : > { %v575_v49 = vpop.f32.mrb[2].mxu1 }
 0x379   : > { %v580_v50 = vmul.f32 0.35355338, %v575_v49  ;;  %v1232_v51 = vpop.f32.mrb[3].mxu1  ;;  %v581_v52 = vsel %vm526_vm3, %v579_v47, -1e+30 }
 0x37a   : > { %v584_v53 = vsel %vm583_vm4, %v581_v52, -inf }
 0x37b   : > { %585 = vmax.xlane.f32.xlu1 %v584_v53  ;;  %v582_v54 = vsel %vm526_vm3, %v580_v50, -1e+30 }
 0x37c   : > { %v587_v55 = vsel %vm583_vm4, %v582_v54, -inf }
 0x37d   : > { %588 = vmax.xlane.f32.xlu0 %v587_v55 }
 0x37e   : > { %v698_v56 = vpop.f32.mrb[4].mxu1 }
 0x37f   : > { %v705_v57 = vmul.f32 0.35355338, %v698_v56  ;;  %v1243_v58 = vpop.f32.mrb[5].mxu1 }
 0x380   : > { %v701_v59 = vpop.f32.mrb[6].mxu1 }
 0x381   : > { %v706_v60 = vmul.f32 0.35355338, %v701_v59  ;;  %v1244_v61 = vpop.f32.mrb[7].mxu1  ;;  %v707_v62 = vsel %vm526_vm3, %v705_v57, -1e+30 }
 0x382   : > { %v709_v63 = vsel %vm583_vm4, %v707_v62, -inf  ;;  %v1179_v57 = vld [vmem:[%s1587_s5] ss:$0 sm:$0xff] }
 0x383   : > { %710 = vmax.xlane.f32.xlu0 %v709_v63  ;;  %v708_v2 = vsel %vm526_vm3, %v706_v60, -1e+30 }
 0x384   : > { %v712_v3 = vsel %vm583_vm4, %v708_v2, -inf }
 0x387   : > { %713 = vmax.xlane.f32.xlu0 %v712_v3 }
 0x408   : > { %v586_v4 = vpop.xlane.xlu1 %585 }
 0x409   : > { %v590_v5 = vsub.f32 %v581_v52, %v586_v4 }
 0x40a   : > { %v589_v6 = vpop.xlane.xlu0 %588 }
 0x40b   : > { %v592_v7 = vmul.f32 1.442695, %v590_v5  ;;  %v591_v8 = vsub.f32 %v582_v54, %v589_v6 }
 0x40d   : > { %1311 = vpow2.f32 %v592_v7  ;;  %v594_v9 = vmul.f32 1.442695, %v591_v8 }
 0x40f   : > { %1313 = vpow2.f32 %v594_v9 }
 0x410   : > { %v711_v10 = vpop.xlane.xlu0 %710 }
 0x411   : > { %v715_v11 = vsub.f32 %v707_v62, %v711_v10 }
 0x413   : > { %v717_v12 = vmul.f32 1.442695, %v715_v11 }
 0x414   : > { %v714_v13 = vpop.xlane.xlu0 %713 }
 0x415   : > { %1315 = vpow2.f32 %v717_v12  ;;  %v716_v14 = vsub.f32 %v708_v2, %v714_v13 }
 0x417   : > { %v1312_v16 = vpop.eup %1311  ;;  %v719_v17 = vmul.f32 1.442695, %v716_v14  ;;  %v1301_v14 = vld [vmem:[%s1590_s8] sm:$0xff]  }
 0x418   : > { %v596_v18 = vsel %vm583_vm4, %v1312_v16, 0.0 }
 0x419   : > { %v1314_v19 = vpop.eup %1313  ;;  %1317 = vpow2.f32 %v719_v17  ;;  %597 = vadd.xlane.f32.xlu1 %v596_v18 }
 0x41a   : > { %v599_v20 = vsel %vm583_vm4, %v1314_v19, 0.0 }
 0x41b   : > { %600 = vadd.xlane.f32.xlu0 %v599_v20 }
 0x41f   : > { %v1316_v21 = vpop.eup %1315 }
 0x420   : > { %v721_v22 = vsel %vm583_vm4, %v1316_v21, 0.0 }
 0x421   : > { %722 = vadd.xlane.f32.xlu1 %v721_v22 }
 0x423   : > { %v1318_v23 = vpop.eup %1317 }
 0x424   : > { %v724_v24 = vsel %vm583_vm4, %v1318_v23, 0.0 }
 0x425   : > { %725 = vadd.xlane.f32.xlu0 %v724_v24  ;;  %v1182_v24 = vld [vmem:[%s1588_s6] ss:$0 sm:$0xff] }
 0x432   : > { %607 = vrot.lane.b32.xlu1 %v1471_v37, %s1352_s20 }
 0x43b   : > { %732 = vrot.lane.b32.xlu0 %v1471_v37, %s1353_s24 }
 0x4a6   : > { %v598_v25 = vpop.xlane.xlu1 %597 }
 0x4a7   : > { %1319 = vrcp.f32 %v598_v25 }
 0x4a8   : > { %v601_v26 = vpop.xlane.xlu0 %600 }
 0x4a9   : > { %1321 = vrcp.f32 %v601_v26 }
 0x4ae   : > { %v723_v27 = vpop.xlane.xlu1 %722 }
 0x4af   : > { %1323 = vrcp.f32 %v723_v27 }
 0x4b1   : > { %v1320_v28 = vpop.eup %1319 }
 0x4b2   : > { %v608_v29 = vpop.permute.xlu1 %607  ;;  %v726_v30 = vpop.xlane.xlu0 %725  ;;  %v604_v32 = vmul.f32 %v1320_v28, %v1312_v16  ;;  %v1302_v16 = vld [vmem:[%s1590_s8 + $0x8] sm:$0xff]  }
 0x4b3   : > { %v1322_v31 = vpop.eup %1321  ;;  %1325 = vrcp.f32 %v726_v30  ;;  %1234 = vmatpush3.bf16.msra.mxu0 %v608_v29  ;;  %v1183_v29 = vld [vmem:[%s1589_s7] ss:$0 sm:$0xff] }
 0x4b4   : > { %v605_v33 = vmul.f32 %v1322_v31, %v1314_v19  ;;  %1245 = vmatprep.subr.bf16.mxu0 %v1347_v15 }
 0x4b6   : > { %v733_v34 = vpop.permute.xlu0 %732  ;;  %v606_v35 = vpack.c.bf16 %v605_v33, %v604_v32 }
 0x4b8   : > { %1236 = vmatmul.mubr.msk.bf16.vlgmr.msra.gmra.mrb[4].mxu0 %vm583_vm4, %v606_v35  ;;  %v1304_v35 = vld [vmem:[%s1592_s10 + $0x8] sm:$0xff]  }
 0x4b9   : > { %1246 = vmatpush3.bf16.msra.mxu0 %v733_v34  ;;  %1247 = vmatprep.mubr.msk.bf16.mxu0 %vm1348_vm1, %v1347_v15  ;;  %v1324_v36 = vpop.eup %1323  ;;  %v1303_v34 = vld [vmem:[%s1592_s10] sm:$0xff]  }
 0x4ba   : > { %1257 = vmatprep.subr.bf16.mxu0 %v1347_v15  ;;  %v729_v38 = vmul.f32 %v1324_v36, %v1316_v21  ;;  %v1305_v36 = vld [vmem:[%s1592_s10 + $0x10] sm:$0xff]  }
 0x4bd   : > { %v1326_v37 = vpop.eup %1325 }
 0x4be   : > { %v730_v39 = vmul.f32 %v1326_v37, %v1318_v23  ;;  %v1306_v37 = vld [vmem:[%s1592_s10 + $0x18] sm:$0xff]  }
 0x4c0   : > { %v731_v40 = vpack.c.bf16 %v730_v39, %v729_v38  ;;  %v1184_v38 = vld [vmem:[%s1591_s9] ss:$0 sm:$0xff] }
 0x4c2   : > { %1248 = vmatmul.mubr.msk.bf16.vlgmr.msra.gmra.mrb[8].mxu0 %vm583_vm4, %v731_v40 }
 0x4c3   : > { %1261 = vmatprep.mubr.msk.bf16.mxu0 %vm1348_vm1, %v1347_v15  ;;  %1258 = vmatpush3.bf16.msra.mxu0 %v1301_v14 }
 0x4c4   : > { %1259 = vmatprep.subr.bf16.mxu0 %v1347_v15 }
 0x4c7   : > { %1260 = vmatpush3.bf16.msra.mxu0 %v1302_v16 }
 0x58b   : > { %v647_v42 = vpop.f32.mrb[4].mxu0 }
 0x58c   : > { %v1237_v43 = vpop.f32.mrb[5].mxu0 }
 0x58d   : > { %v650_v44 = vpop.f32.mrb[6].mxu0 }
 0x58e   : > { %v1238_v45 = vpop.f32.mrb[7].mxu0 }
 0x595   : > { %v772_v46 = vpop.f32.mrb[8].mxu0 }
 0x596   : > { %v1249_v47 = vpop.f32.mrb[9].mxu0 }
 0x597   : > { %v775_v48 = vpop.f32.mrb[10].mxu0 }
 0x598   : > { %v1293_v49 = vpack.i.bf16 %v775_v48, %v772_v46  ;;  %v1250_v50 = vpop.f32.mrb[11].mxu0 }
 0x59a   : > { %1294 = vrot.lane.b32.xlu1 %v1293_v49, %s1354_s27 }
 0x60c   : > { %v1295_v51 = vpop.permute.xlu1 %1294 }
 0x60d   : > { %v1297_v52 = vunpack.i.h.bf16 %v1295_v51  ;;  %v1296_v53 = vunpack.i.l.bf16 %v1295_v51 }
 0x60f   : > { %v788_v54 = vsel %vm531_vm2, %v650_v44, %v1297_v52  ;;  %v787_v55 = vsel %vm531_vm2, %v647_v42, %v1296_v53 }
 0x610   : > { %v789_v56 = vpack.c.bf16 %v788_v54, %v787_v55 }
 0x612   : > { %1254 = vmatmul.mubr.msk.bf16.vlgmr.msra.gmra.mrb[8].mxu1 %vm583_vm4, %v789_v56 }
 0x613   : > { %1273 = vmatprep.mubr.msk.bf16.mxu1 %vm1348_vm1, %v1347_v15  ;;  %1266 = vmatpush3.bf16.msra.mxu1 %v1303_v34  ;;  %v1188_v34 = vld [vmem:[%s1593_s11] ss:$0 sm:$0xff] }
 0x614   : > { %1267 = vmatprep.subr.bf16.mxu1 %v1347_v15 }
 0x617   : > { %1268 = vmatpush3.bf16.msra.mxu1 %v1304_v35 }
 0x618   : > { %1269 = vmatprep.subr.bf16.mxu1 %v1347_v15 }
 0x61b   : > { %1270 = vmatpush3.bf16.msra.mxu1 %v1305_v36 }
 0x61c   : > { %1271 = vmatprep.subr.bf16.mxu1 %v1347_v15 }
 0x61f   : > { %1272 = vmatpush3.bf16.msra.mxu1 %v1306_v37 }
 0x6e5   : > { %v842_v58 = vpop.f32.mrb[8].mxu1 }
 0x6e6   : > { %v843_v59 = vadd.f32 %v1179_v57, %v842_v58  ;;  %v1255_v60 = vpop.f32.mrb[9].mxu1 }
 0x6e7   : > { %v845_v61 = vpop.f32.mrb[10].mxu1 }
 0x6e8   : > { %v1522_v62 = vadd.f32 %v843_v59, %v1436_v0  ;;  %v846_v63 = vadd.f32 %v1179_v57, %v845_v61  ;;  %v1256_v2 = vpop.f32.mrb[11].mxu1 }
 0x6ea   : > { %v1525_v3 = vadd.f32 %v846_v63, %v1438_v1  ;;  %v853_v4 = vsel %vm419_vm0, %v1522_v62, 0.0 }
 0x6eb   : > { %854 = vadd.xlane.f32.xlu1 %v853_v4 }
 0x6ec   : > { %v856_v5 = vsel %vm419_vm0, %v1525_v3, 0.0 }
 0x6ed   : > { %857 = vadd.xlane.f32.xlu0 %v856_v5 }
 0x778   : > { %v855_v6 = vpop.xlane.xlu1 %854 }
 0x779   : > { %v859_v7 = vmul.f32 0.03125, %v855_v6 }
 0x77a   : > { %v858_v8 = vpop.xlane.xlu0 %857 }
 0x77b   : > { %v861_v9 = vsub.f32 %v1522_v62, %v859_v7  ;;  %v860_v0 = vmul.f32 0.03125, %v858_v8 }
 0x77d   : > { %v862_v10 = vsub.f32 %v1525_v3, %v860_v0  ;;  %v863_v11 = vmul.f32 %v861_v9, %v861_v9 }
 0x77f   : > { %v865_v1 = vsel %vm419_vm0, %v863_v11, 0.0  ;;  %v864_v12 = vmul.f32 %v862_v10, %v862_v10 }
 0x780   : > { %866 = vadd.xlane.f32.xlu0 %v865_v1 }
 0x781   : > { %v868_v13 = vsel %vm419_vm0, %v864_v12, 0.0 }
 0x782   : > { %869 = vadd.xlane.f32.xlu1 %v868_v13 }
 0x80d   : > { %v867_v17 = vpop.xlane.xlu0 %866 }
 0x80e   : > { %v871_v18 = vmul.f32 0.03125, %v867_v17 }
 0x80f   : > { %v870_v19 = vpop.xlane.xlu1 %869 }
 0x810   : > { %v873_v20 = vadd.f32 1e-05, %v871_v18  ;;  %v872_v21 = vmul.f32 0.03125, %v870_v19 }
 0x812   : > { %1327 = vrsqrt.f32 %v873_v20  ;;  %v874_v22 = vadd.f32 1e-05, %v872_v21 }
 0x814   : > { %1329 = vrsqrt.f32 %v874_v22 }
 0x81c   : > { %v1328_v23 = vpop.eup %1327 }
 0x81d   : > { %v877_v25 = vmul.f32 %v1328_v23, %v861_v9 }
 0x81e   : > { %v1330_v26 = vpop.eup %1329 }
 0x81f   : > { %v885_v27 = vmul.f32 %v1182_v24, %v877_v25  ;;  %v878_v28 = vmul.f32 %v1330_v26, %v862_v10 }
 0x821   : > { %v886_v30 = vmul.f32 %v1182_v24, %v878_v28  ;;  %v893_v31 = vadd.f32 %v1183_v29, %v885_v27 }
 0x823   : > { %v894_v32 = vadd.f32 %v1183_v29, %v886_v30 }
 0x825   : > { %v895_v33 = vpack.c.bf16 %v894_v32, %v893_v31 }
 0x827   : > { %1262 = vmatmul.mubr.msk.bf16.vlgmr.msra.gmra.mrb[12].mxu0 %vm419_vm0, %v895_v33 }
 0x8fa   : > { %v956_v39 = vpop.f32.mrb[12].mxu0 }
 0x8fb   : > { %v957_v40 = vadd.f32 %v1184_v38, %v956_v39  ;;  %v1263_v41 = vpop.f32.mrb[13].mxu0 }
 0x8fc   : > { %v959_v42 = vpop.f32.mrb[14].mxu0 }
 0x8fd   : > { %v965_v43 = vmul.f32 0.70710677, %v957_v40  ;;  %v960_v44 = vadd.f32 %v1184_v38, %v959_v42  ;;  %v1264_v45 = vpop.f32.mrb[15].mxu0  ;;  %v963_v28 = vmul.f32 0.5, %v957_v40 }
 0x8ff   : > { %v967_v46 = vand.u32 2147483647, %v965_v43  ;;  %v966_v47 = vmul.f32 0.70710677, %v960_v44  ;;  %vm1007_vm5 = vcmp.ge.f32.partialorder %v965_v43, 0.0  ;;  %v964_v29 = vmul.f32 0.5, %v960_v44 }
 0x901   : > { %v969_v48 = vmul.f32 0.3275911, %v967_v46  ;;  %v968_v15 = vand.u32 2147483647, %v966_v47  ;;  %v995_v52 = vsub.f32 0.0, %v967_v46  ;;  %vm1008_vm6 = vcmp.ge.f32.partialorder %v966_v47, 0.0 }
 0x903   : > { %v971_v49 = vadd.f32 1.0, %v969_v48  ;;  %v970_v50 = vmul.f32 0.3275911, %v968_v15  ;;  %v996_v53 = vsub.f32 0.0, %v968_v15  ;;  %v997_v55 = vmul.f32 %v995_v52, %v967_v46 }
 0x905   : > { %1331 = vrcp.f32 %v971_v49  ;;  %v972_v51 = vadd.f32 1.0, %v970_v50  ;;  %v998_v59 = vmul.f32 %v996_v53, %v968_v15  ;;  %v999_v60 = vmul.f32 1.442695, %v997_v55 }
 0x907   : > { %1333 = vrcp.f32 %v972_v51  ;;  %v1001_v5 = vmul.f32 1.442695, %v998_v59 }
 0x908   : > { %1335 = vpow2.f32 %v999_v60 }
 0x909   : > { %1337 = vpow2.f32 %v1001_v5 }
 0x90f   : > { %v1332_v54 = vpop.eup %1331 }
 0x910   : > { %v977_v56 = vmul.f32 1.0614054, %v1332_v54 }
 0x911   : > { %v1334_v57 = vpop.eup %1333 }
 0x912   : > { %v979_v58 = vadd.f32 -1.4531521, %v977_v56  ;;  %v978_v61 = vmul.f32 1.0614054, %v1334_v57  ;;  %v1336_v14 = vpop.eup %1335 }
 0x913   : > { %v1338_v19 = vpop.eup %1337 }
 0x914   : > { %v981_v63 = vmul.f32 %v1332_v54, %v979_v58  ;;  %v980_v2 = vadd.f32 -1.4531521, %v978_v61 }
 0x916   : > { %v983_v4 = vadd.f32 1.4214138, %v981_v63  ;;  %v982_v6 = vmul.f32 %v1334_v57, %v980_v2 }
 0x918   : > { %v985_v7 = vmul.f32 %v1332_v54, %v983_v4  ;;  %v984_v8 = vadd.f32 1.4214138, %v982_v6 }
 0x91a   : > { %v987_v9 = vadd.f32 -0.28449672, %v985_v7  ;;  %v986_v0 = vmul.f32 %v1334_v57, %v984_v8 }
 0x91c   : > { %v989_v10 = vmul.f32 %v1332_v54, %v987_v9  ;;  %v988_v11 = vadd.f32 -0.28449672, %v986_v0 }
 0x91e   : > { %v991_v1 = vadd.f32 0.2548296, %v989_v10  ;;  %v990_v12 = vmul.f32 %v1334_v57, %v988_v11 }
 0x920   : > { %v993_v13 = vmul.f32 %v1332_v54, %v991_v1  ;;  %v992_v16 = vadd.f32 0.2548296, %v990_v12 }
 0x922   : > { %v1003_v17 = vmul.f32 %v1336_v14, %v993_v13  ;;  %v994_v18 = vmul.f32 %v1334_v57, %v992_v16 }
 0x924   : > { %v1005_v20 = vsub.f32 1.0, %v1003_v17  ;;  %v1004_v21 = vmul.f32 %v1338_v19, %v994_v18 }
 0x926   : > { %v1009_v22 = vsub.f32 0.0, %v1005_v20  ;;  %v1006_v23 = vsub.f32 1.0, %v1004_v21 }
 0x928   : > { %v1011_v24 = vsel %vm1007_vm5, %v1005_v20, %v1009_v22  ;;  %v1010_v25 = vsub.f32 0.0, %v1006_v23 }
 0x929   : > { %v1013_v26 = vadd.f32 1.0, %v1011_v24 }
 0x92a   : > { %v1012_v27 = vsel %vm1008_vm6, %v1006_v23, %v1010_v25 }
 0x92b   : > { %v1014_v30 = vadd.f32 1.0, %v1012_v27  ;;  %v1015_v31 = vmul.f32 %v1013_v26, %v963_v28 }
 0x92d   : > { %v1016_v32 = vmul.f32 %v1014_v30, %v964_v29 }
 0x92f   : > { %v1017_v33 = vpack.c.bf16 %v1016_v32, %v1015_v31 }
 0x931   : > { %1274 = vmatmul.mubr.msk.bf16.vlgmr.msra.gmra.mrb[12].mxu1 %vm1057_vm7, %v1017_v33 }
 0xa04   : > { %v1095_v35 = vpop.f32.mrb[12].mxu1 }
 0xa05   : > { %v1096_v36 = vadd.f32 %v1188_v34, %v1095_v35  ;;  %v1275_v37 = vpop.f32.mrb[13].mxu1 }
 0xa06   : > { %v1098_v38 = vpop.f32.mrb[14].mxu1 }
 0xa07   : > { %v1102_v39 = vadd.f32 %v1096_v36, %v1522_v62  ;;  %v1099_v40 = vadd.f32 %v1188_v34, %v1098_v38  ;;  %v1276_v41 = vpop.f32.mrb[15].mxu1 }
 0xa09   : > { %1104 = vst.msk [vmem:[%s413_s19] sm:$0xff] %vm419_vm0, %v1102_v39  ;;  %v1103_v42 = vadd.f32 %v1099_v40, %v1525_v3 }
 0xa0b   : > { %1105 = vst.msk [vmem:[%s413_s19 + $0x8] sm:$0xff] %vm419_vm0, %v1103_v42 }
 0xa0c PF: > { %s22_s21 = sadd.s32 1, %s1345_s21  }
 0xa0d   : > { %p19_p4 = scmp.ge.s32.totalorder %s22_s21, 4  }
 0xa0f   :  { %21 = sbr.rel (!%p19_p4) target bundleno = 1 (0x1), region = 98 }

// kernel: vit_forward.7
= control target key start
LH: loop header
LB: loop body
LE: loop exit
PB: predicated region body
PF: predicated region fallthrough
CT: control target
= control target key end

     0   :  { %vm25_vm0 = vcmask 254976   ;;  %s249_s0 = inlined_call_operand.vmem [shape: f32[2,32], index: 0, kind: input, shape index: {}]   ;;  %s250_s1 = inlined_call_operand.vmem [shape: f32[1,32], index: 1, kind: input, shape index: {}]   ;;  %s251_s2 = inlined_call_operand.vmem [shape: f32[1,32], index: 2, kind: input, shape index: {}]   ;;  %s252_s3 = inlined_call_operand.vmem [shape: bf16[32,4], index: 3, kind: input, shape index: {}]   ;;  %s253_s4 = inlined_call_operand.vmem [shape: f32[1,4], index: 4, kind: input, shape index: {}]   ;;  %s254_s5 = inlined_call_operand.hbm [shape: f32[2,4], index: 5, kind: output, shape index: {}]  }
   0x1   :  { %v22_v0 = vld [vmem:[%s249_s0] sm:$0x3] }
   0x2   :  { %v26_v1 = vsel %vm25_vm0, %v22_v0, 0.0 }
   0x3   :  { %27 = vadd.xlane.f32.xlu0 %v26_v1 }
   0x4   :  { %10 = vsyncpa [#allocation3], 0  ;;  %v158_v7 = vld [vmem:[%s252_s3] sm:$0xff]   ;;  %v186_v8 = vmov 0.0   ;;  %v159_v9 = vld [vmem:[%s252_s3 + $0x8] sm:$0xff]   ;;  %vm187_vm1 = vmmov 0  }
   0x5   :  { %147 = vmatprep.subr.bf16.mxu0 %v186_v8  ;;  %151 = vmatprep.mubr.msk.bf16.mxu0 %vm187_vm1, %v186_v8  ;;  %v138_v14 = vld [vmem:[%s250_s1] ss:$0 sm:$0xff]  ;;  %vm78_vm2 = vcmask 261120   ;;  %s188_s28 = smov [#allocation2]   ;;  %vm122_vm3 = vcmask 25600  }
   0x6   :  { %148 = vmatpush3.bf16.msra.mxu0 %v158_v7  ;;  %v139_v16 = vld [vmem:[%s251_s2] ss:$0 sm:$0xff]  ;;  %s130_s29 = sshll.u32 %s188_s28, 4  ;;  %s131_s29 = int_to_ptr.vmem [resolvable:$true] %s130_s29 }
   0x7   :  { %149 = vmatprep.subr.bf16.mxu0 %v186_v8  ;;  %v140_v20 = vld [vmem:[%s253_s4] ss:$0 sm:$0xff]  ;;  %s162_s1 = scalar_lea.vmem %s131_s29, 32  ;;  %p167_p1 = scmp.lt.s32.totalorder %s131_s29, %s131_s29 }
   0x8   :  { %p163_p0 = scmp.ne.s32.totalorder %s131_s29, %s162_s1  ;;  %p168_p2 = scmp.lt.s32.totalorder %s162_s1, %s162_s1 }
   0xa   :  { %150 = vmatpush3.bf16.msra.mxu0 %v159_v9  ;;  %p169_p3 = por %p168_p2, %p167_p1 }
   0xc   :  { %p170_p4 = pnand %p169_p3, %p163_p0 }
  0x90   :  { %v28_v2 = vpop.xlane.xlu0 %27 }
  0x91   :  { %v30_v3 = vmul.f32 0.03125, %v28_v2 }
  0x93   :  { %v31_v4 = vsub.f32 %v22_v0, %v30_v3 }
  0x95   :  { %v32_v5 = vmul.f32 %v31_v4, %v31_v4 }
  0x97   :  { %v33_v6 = vsel %vm25_vm0, %v32_v5, 0.0 }
  0x98   :  { %34 = vadd.xlane.f32.xlu0 %v33_v6 }
 0x125   :  { %v35_v10 = vpop.xlane.xlu0 %34 }
 0x126   :  { %v36_v11 = vmul.f32 0.03125, %v35_v10 }
 0x128   :  { %v37_v12 = vadd.f32 1e-05, %v36_v11 }
 0x12a   :  { %160 = vrsqrt.f32 %v37_v12 }
 0x134   :  { %v161_v13 = vpop.eup %160 }
 0x135   :  { %v39_v15 = vmul.f32 %v161_v13, %v31_v4 }
 0x137   :  { %v46_v17 = vmul.f32 %v138_v14, %v39_v15 }
 0x139   :  { %v53_v18 = vadd.f32 %v139_v16, %v46_v17 }
 0x13b   :  { %v54_v19 = vpack.c.bf16 %v53_v18, %v53_v18 }
 0x13d   :  { %152 = vmatmul.mubr.msk.bf16.vlgmr.msra.gmra.mrb[0].mxu0 %vm78_vm2, %v54_v19 }
 0x210   :  { %v116_v21 = vpop.f32.mrb[0].mxu0 }
 0x211   :  { %v117_v22 = vadd.f32 %v140_v20, %v116_v21  ;;  %v153_v23 = vpop.f32.mrb[1].mxu0 }
 0x212   :  { %v119_v24 = vpop.f32.mrb[2].mxu0 }
 0x213   :  { %v154_v25 = vpop.f32.mrb[3].mxu0  ;;  %123 = vst.msk [vmem:[#allocation2] sm:$0x3] %vm122_vm3, %v117_v22 }
 0x214   :  { %173 = shalt.err (!%p170_p4)
}
 0x215   :  { %s174_s4 = scalar_lea.hbm %s254_s5, 32 }
 0x216   :  { %p175_p5 = scmp.ne.s32.totalorder %s254_s5, %s174_s4  ;;  %p178_p6 = scmp.lt.u32.totalorder %s174_s4, %s254_s5 }
 0x218   :  { %p180_p7 = pnand %p178_p6, %p175_p5 }
 0x21a   :  { %183 = shalt.err (!%p180_p7)
}
 0x21b   :  { %133 = dma.vmem_to_hbm [thread:$0]  %s131_s29, 32, %s254_s5, [#allocation3]  }
 0x21c   :  { %184 = dma.done.wait [#allocation3], 32  }
 0x21d   :  { %185 = vsyncadd [#allocation3], 4294967264 }
 0x21e   :  { %137 = vsyncpa [#allocation3], 1 }

</bundles_post_ra>
